<compile_context>
chip_gen: v5e
topology: v5e:2x2
jax: 0.10.0
libtpu: 0.0.40
codegen_flags: <defaults>
</compile_context>

<pallas_src>
import functools

import jax
import jax.numpy as jnp
from jax.experimental import pallas as pl
from jax.experimental.pallas import tpu as pltpu

BN_EPS = 1e-5
VMEM_LIMIT = 32 * 1024 * 1024  # per-step working set is well under 4 MiB


# ---------------------------------------------------------------------------
# Tiling helper
# ---------------------------------------------------------------------------

def _pick_tile(m):
    """Largest lane-dense tile (multiple of 128, <=2048) that divides m.
    Capped at 2048 so realistic M (e.g. 4096) still yields >=2 m-chunks for
    v7x dual-TensorCore sharding of the stats pass; 2048 is already at the
    HBM-roofline plateau (512 ~ 85%, 1024+ ~ 86%)."""
    for t in (2048, 1024, 512, 256, 128):
        if m % t == 0:
            return t
    return m  # small / ragged M: a single full-width tile is always legal


# ---------------------------------------------------------------------------
# Pallas kernels
# ---------------------------------------------------------------------------

def _conv1x1_stats_kernel(x_ref, w_ref, sum_ref, ssq_ref):
    """Pass 1: y = W @ x_tile (bf16 MXU, f32 acc); write per-(b, m-chunk)
    partial sum / sum-of-squares.  No cross-step accumulation -> both grid
    axes are 'parallel' (megacore-shardable on v7x)."""
    y = jnp.dot(w_ref[...], x_ref[...],
                preferred_element_type=jnp.float32)            # (C_out, TM) f32
    sum_ref[...] = jnp.sum(y, axis=1, keepdims=True)           # (C_out, 1)
    ssq_ref[...] = jnp.sum(y * y, axis=1, keepdims=True)


def _trans_offset_kernel(x_ref, ws_ref, shift_ref, woff_ref, o_ref):
    """Pass 2 for `trans` fused with `pred_offset`.  The BN scale is folded
    into ws_ref, so BN is just `+ shift`; the BN+ReLU'd 64-channel feature is
    consumed in-register by the (3, C) offset matmul + tanh and never touches
    HBM."""
    y = jnp.dot(ws_ref[...], x_ref[...],
                preferred_element_type=jnp.float32)            # (C_mid, TM) f32
    g = jnp.maximum(y + shift_ref[...], 0.0)                   # BN + ReLU, f32
    off = jnp.dot(woff_ref[...], g.astype(jnp.bfloat16),
                  preferred_element_type=jnp.float32)          # (3, TM)
    o_ref[...] = jnp.tanh(off).astype(o_ref.dtype)


def _residual_fused_kernel(x_ref, w_ref, gamma_ref, beta_ref, o_ref):
    """Single-launch residual path: x is (C_in, B*S) (batch and nodes folded
    into the lane axis), so the 1x1 conv, the training-mode batch statistics
    (over all B*S*1 positions) and the BN + ReLU epilogue are all done in one
    kernel with no HBM round-trip for the conv output."""
    y = jnp.dot(w_ref[...], x_ref[...],
                preferred_element_type=jnp.float32)            # (C_out, M_all)
    inv_n = 1.0 / y.shape[1]
    mean = jnp.sum(y, axis=1, keepdims=True) * inv_n           # (C_out, 1)
    var = jnp.maximum(jnp.sum(y * y, axis=1, keepdims=True) * inv_n
                      - mean * mean, 0.0)
    scale = gamma_ref[...] * jax.lax.rsqrt(var + BN_EPS)
    shift = beta_ref[...] - mean * scale
    o_ref[...] = jnp.maximum(y * scale + shift, 0.0).astype(o_ref.dtype)


# ---------------------------------------------------------------------------
# Wrappers around pallas_call
# ---------------------------------------------------------------------------

def _conv1x1_batch_stats(x_bf16, w_bf16):
    """x: (B, C_in, M) bf16, w: (C_out, C_in) bf16.  Per-channel mean and
    *biased* variance of the 1x1-conv output over all B*M positions."""
    B, C_in, M = x_bf16.shape
    C_out = w_bf16.shape[0]
    tm = _pick_tile(M)
    n_m = M // tm
    sums, ssqs = pl.pallas_call(
        _conv1x1_stats_kernel,
        out_shape=(jax.ShapeDtypeStruct((B, n_m, C_out, 1), jnp.float32),
                   jax.ShapeDtypeStruct((B, n_m, C_out, 1), jnp.float32)),
        grid=(B, n_m),
        in_specs=[
            pl.BlockSpec((None, C_in, tm), lambda b, m: (b, 0, m)),
            pl.BlockSpec((C_out, C_in), lambda b, m: (0, 0)),
        ],
        out_specs=(
            pl.BlockSpec((None, None, C_out, 1), lambda b, m: (b, m, 0, 0)),
            pl.BlockSpec((None, None, C_out, 1), lambda b, m: (b, m, 0, 0)),
        ),
        compiler_params=pltpu.CompilerParams(
            dimension_semantics=("parallel", "parallel"),
            vmem_limit_bytes=VMEM_LIMIT),
    )(x_bf16, w_bf16)
    cnt = jnp.float32(B * M)
    mean = jnp.sum(sums[..., 0], axis=(0, 1)) / cnt                      # (C_out,)
    var = jnp.maximum(jnp.sum(ssqs[..., 0], axis=(0, 1)) / cnt - mean * mean, 0.0)
    return mean, var


def _fold_bn_into_weight(w_f32, mean, var, gamma, beta):
    """gamma*(Wx - mean)*rsqrt(var+eps) + beta  ==  (scale*W)x + shift.
    Folding the scale into W is exact (it applies before the ReLU)."""
    scale = gamma * jax.lax.rsqrt(var + BN_EPS)                          # (C_out,)
    w_scaled = (w_f32 * scale[:, None]).astype(jnp.bfloat16)
    shift = (beta - mean * scale)[:, None].astype(jnp.float32)           # (C_out, 1)
    return w_scaled, shift


def trans_and_pred_offset(group_fea, w_trans, gamma, beta, w_off):
    """self.pred_offset(self.trans(x)):
    (1x1 conv -> BN(train stats) -> ReLU) -> (1x1 conv, bias=False) -> tanh.
    Conv bias dropped (cancelled by BN mean subtraction).
    # TODO(synk): BatchNorm running_mean / running_var (training-time side
    # effect only, does not affect this forward output) is not updated here.
    """
    B, C_in, S, K = group_fea.shape
    C_mid = w_trans.shape[0]
    C_off = w_off.shape[0]
    M = S * K
    x = group_fea.reshape(B, C_in, M).astype(jnp.bfloat16)   # no-op if already bf16

    mean, var = _conv1x1_batch_stats(x, w_trans.astype(jnp.bfloat16))
    w_scaled, shift = _fold_bn_into_weight(w_trans, mean, var, gamma, beta)

    tm = _pick_tile(M)
    n_m = M // tm
    off = pl.pallas_call(
        _trans_offset_kernel,
        out_shape=jax.ShapeDtypeStruct((B, C_off, M), jnp.float32),
        grid=(B, n_m),
        in_specs=[
            pl.BlockSpec((None, C_in, tm), lambda b, m: (b, 0, m)),
            pl.BlockSpec((C_mid, C_in), lambda b, m: (0, 0)),
            pl.BlockSpec((C_mid, 1), lambda b, m: (0, 0)),
            pl.BlockSpec((C_off, C_mid), lambda b, m: (0, 0)),
        ],
        out_specs=pl.BlockSpec((None, C_off, tm), lambda b, m: (b, 0, m)),
        compiler_params=pltpu.CompilerParams(
            dimension_semantics=("parallel", "parallel"),
            vmem_limit_bytes=VMEM_LIMIT),
    )(x, w_scaled, shift, w_off.astype(jnp.bfloat16))
    return off.reshape(B, C_off, S, K)


def residual_conv_bn_relu(fea_bcs, w, gamma, beta):
    """self.residual(fpoint_fea.unsqueeze(-1)):
    1x1 conv -> BN (training stats over B*S*1 positions) -> ReLU.
    B and S are folded into one lane axis and everything (including the batch
    statistics) runs in a single pallas_call."""
    B, C_in, S = fea_bcs.shape
    C_out = w.shape[0]
    M_all = B * S
    x = jnp.transpose(fea_bcs, (1, 0, 2)).reshape(C_in, M_all).astype(jnp.bfloat16)
    out = pl.pallas_call(
        _residual_fused_kernel,
        out_shape=jax.ShapeDtypeStruct((C_out, M_all), jnp.float32),
        grid=(1,),
        in_specs=[
            pl.BlockSpec((C_in, M_all), lambda i: (0, 0)),
            pl.BlockSpec((C_out, C_in), lambda i: (0, 0)),
            pl.BlockSpec((C_out, 1), lambda i: (0, 0)),
            pl.BlockSpec((C_out, 1), lambda i: (0, 0)),
        ],
        out_specs=pl.BlockSpec((C_out, M_all), lambda i: (0, 0)),
        compiler_params=pltpu.CompilerParams(
            dimension_semantics=("arbitrary",),
            vmem_limit_bytes=VMEM_LIMIT),
    )(x, w.astype(jnp.bfloat16),
      gamma.reshape(C_out, 1).astype(jnp.float32),
      beta.reshape(C_out, 1).astype(jnp.float32))
    # (C_out, B*S) -> (B, C_out, S, 1)
    return jnp.transpose(out.reshape(C_out, B, S), (1, 0, 2))[:, :, :, None]


# ---------------------------------------------------------------------------
# point_utils glue (data-dependent gathers; plain JAX — see JSON "untranslatable")
# ---------------------------------------------------------------------------

def index_points(points, idx):
    """points: (B, C, N); idx: (B, ...) int indices into N -> (B, C, ...)."""
    return jax.vmap(lambda p, i: jnp.take(p, i, axis=1))(points, idx)


def farthest_point_sample(xyz, npoint):
    """xyz: (B, 3, N) -> (B, npoint) FPS indices.
    # TODO(synk): the PyTorch reference seeds FPS with torch.randint; here we
    # start deterministically from point 0."""
    B, _, N = xyz.shape

    def body(i, state):
        distance, farthest, centroids = state
        centroids = centroids.at[:, i].set(farthest)
        centroid = index_points(xyz, farthest[:, None])            # (B, 3, 1)
        dist = jnp.sum((xyz - centroid) ** 2, axis=1)              # (B, N)
        distance = jnp.minimum(distance, dist)
        farthest = jnp.argmax(distance, axis=-1).astype(jnp.int32)
        return distance, farthest, centroids

    state = (jnp.full((B, N), 1e10, dtype=jnp.float32),
             jnp.zeros((B,), dtype=jnp.int32),
             jnp.zeros((B, npoint), dtype=jnp.int32))
    _, _, centroids = jax.lax.fori_loop(0, npoint, body, state)
    return centroids


def query_ball_point(radius, nsample, xyz, new_xyz):
    """xyz: (B, 3, N); new_xyz: (B, 3, S) -> (B, S, nsample) neighbor indices
    (standard PointNet++ semantics: pad misses with the first hit)."""
    B, _, N = xyz.shape
    S = new_xyz.shape[2]
    diff = new_xyz[:, :, :, None] - xyz[:, :, None, :]             # (B, 3, S, N)
    sqrdists = jnp.sum(diff * diff, axis=1)                        # (B, S, N)
    base = jnp.broadcast_to(jnp.arange(N, dtype=jnp.int32), (B, S, N))
    group_idx = jnp.where(sqrdists > radius * radius, N, base)
    group_idx = jnp.sort(group_idx, axis=-1)[:, :, :nsample]
    group_first = jnp.broadcast_to(group_idx[:, :, :1], group_idx.shape)
    return jnp.where(group_idx == N, group_first, group_idx)


# ---------------------------------------------------------------------------
# adapt_layer_off forward
# ---------------------------------------------------------------------------

def adapt_layer_off_forward(params, input_fea, input_loc, *,
                            num_node=64, nsample=64, radius=0.3):
    """input_fea: (B, C, N) point features; input_loc: (B, 3, N) coordinates."""
    fpoint_idx = farthest_point_sample(input_loc, num_node)               # (B, S)
    fpoint_loc = index_points(input_loc, fpoint_idx)                      # (B, 3, S)
    fpoint_fea = index_points(input_fea, fpoint_idx)                      # (B, C, S) f32
    group_idx = query_ball_point(radius, nsample, input_loc, fpoint_loc)  # (B, S, K)
    # Gather straight from a bf16 view of the features: group_fea is the
    # dominant HBM tensor (written once, read twice by the kernels) -> halve it.
    # TODO(synk): fusing this gather into the Pallas passes via scalar-prefetched
    # group_idx would remove the HBM materialization entirely.
    group_fea = index_points(input_fea.astype(jnp.bfloat16), group_idx)   # (B, C, S, K)

    # seman_trans = pred_offset(trans(group_fea))              -> (B, 3, S, K)
    seman_trans = trans_and_pred_offset(
        group_fea, params["w_trans"], params["gamma_trans"],
        params["beta_trans"], params["w_off"])

    # Same as the reference's permute/unsqueeze/permute dance:
    # fpoint_loc_trans[b, d, s, k] = fpoint_loc[b, d, s] + seman_trans[b, d, s, k]
    fpoint_loc_trans = fpoint_loc[:, :, :, None] + seman_trans            # (B, 3, S, K)

    # node_fea = residual(fpoint_fea.unsqueeze(-1))             -> (B, fc_dim, S, 1)
    node_fea = residual_conv_bn_relu(fpoint_fea, params["w_res"],
                                     params["gamma_res"], params["beta_res"])

    return fpoint_fea, node_fea, fpoint_loc_trans


if __name__ == "__main__":
    # Small shapes consistent with the module (channel dims = 64, offset_dim = 3,
    # nsample = 64 is hardcoded in the reference forward); num_node kept small.
    B, C, N_PTS = 2, 64, 256
    NUM_NODE, NSAMPLE, OFFSET_DIM, FC_DIM = 16, 64, 3, 64

    key = jax.random.PRNGKey(0)
    k_fea, k_loc, k1, k2, k3 = jax.random.split(key, 5)
    input_fea = jax.random.normal(k_fea, (B, C, N_PTS), dtype=jnp.float32)
    input_loc = jax.random.uniform(k_loc, (B, 3, N_PTS), minval=-1.0, maxval=1.0,
                                   dtype=jnp.float32)

    bound = 1.0 / (C ** 0.5)   # kaiming-uniform-ish for 1x1 conv, fan_in = C
    params = {
        # Conv biases are intentionally not created: they are exactly cancelled
        # by the training-mode BatchNorm mean subtraction.
        "w_trans": jax.random.uniform(k1, (C, C), minval=-bound, maxval=bound,
                                      dtype=jnp.float32),
        "gamma_trans": jnp.ones((C,), jnp.float32),
        "beta_trans": jnp.zeros((C,), jnp.float32),
        "w_off": jax.random.uniform(k2, (OFFSET_DIM, C), minval=-bound,
                                    maxval=bound, dtype=jnp.float32),
        "w_res": jax.random.uniform(k3, (FC_DIM, C), minval=-bound, maxval=bound,
                                    dtype=jnp.float32),
        "gamma_res": jnp.ones((FC_DIM,), jnp.float32),
        "beta_res": jnp.zeros((FC_DIM,), jnp.float32),
    }

    fwd = jax.jit(functools.partial(adapt_layer_off_forward,
                                    num_node=NUM_NODE, nsample=NSAMPLE, radius=0.3))
    fpoint_fea, node_fea, fpoint_loc_trans = fwd(params, input_fea, input_loc)
    jax.block_until_ready((fpoint_fea, node_fea, fpoint_loc_trans))

    assert fpoint_fea.shape == (B, C, NUM_NODE)
    assert node_fea.shape == (B, FC_DIM, NUM_NODE, 1)
    assert fpoint_loc_trans.shape == (B, OFFSET_DIM, NUM_NODE, NSAMPLE)
    assert bool(jnp.all(jnp.isfinite(node_fea)))
    assert bool(jnp.all(jnp.isfinite(fpoint_loc_trans)))
    print("KERNEL_OK")
</pallas_src>

<mosaic_0001>
module attributes {stable_mosaic.version = 11 : i64} {
  func.func @_conv1x1_stats_kernel(%arg0: i32, %arg1: i32, %arg2: memref<1x64x1024xbf16, #tpu.memory_space<vmem>>, %arg3: memref<64x64xbf16, #tpu.memory_space<vmem>>, %arg4: memref<1x1x64x1xf32, #tpu.memory_space<vmem>>, %arg5: memref<1x1x64x1xf32, #tpu.memory_space<vmem>>) attributes {dimension_semantics = [#tpu.dimension_semantics<parallel>, #tpu.dimension_semantics<parallel>], iteration_bounds = array<i64: 2, 1>, scalar_prefetch = 0 : i64, scratch_operands = 0 : i64, tpu.core_type = #tpu.core_type<tc>, window_params = [{transform_indices = @transform_0, window_bounds = array<i64: 1, 64, 1024>}, {pipeline_mode = #tpu.pipeline_mode<synchronous>, transform_indices = @transform_1, window_bounds = array<i64: 64, 64>}, {transform_indices = @transform_2, window_bounds = array<i64: 1, 1, 64, 1>}, {transform_indices = @transform_3, window_bounds = array<i64: 1, 1, 64, 1>}]} {
    %c0 = arith.constant 0 : index
    %c0_0 = arith.constant 0 : index
    %0 = vector.load %arg3[%c0, %c0_0] : memref<64x64xbf16, #tpu.memory_space<vmem>>, vector<64x64xbf16>
    %c0_1 = arith.constant 0 : index
    %c0_2 = arith.constant 0 : index
    %c0_3 = arith.constant 0 : index
    %1 = vector.load %arg2[%c0_1, %c0_2, %c0_3] : memref<1x64x1024xbf16, #tpu.memory_space<vmem>>, vector<1x64x1024xbf16>
    %2 = vector.shape_cast %1 : vector<1x64x1024xbf16> to vector<64x1024xbf16>
    %cst = arith.constant dense<0.000000e+00> : vector<64x1024xf32>
    %3 = tpu.matmul %0, %2, %cst {dimension_numbers = #tpu.dot_dimension_numbers<[1], [0], [0], [1], [0, 0, 1, 1], [], []>} : vector<64x64xbf16>, vector<64x1024xbf16>, vector<64x1024xf32> -> vector<64x1024xf32>
    %cst_4 = arith.constant dense<0.000000e+00> : vector<64xf32>
    %4 = vector.multi_reduction <add>, %3, %cst_4 [1] : vector<64x1024xf32> to vector<64xf32>
    %5 = vector.shape_cast %4 : vector<64xf32> to vector<64x1xf32>
    %c0_5 = arith.constant 0 : index
    %c0_6 = arith.constant 0 : index
    %c0_7 = arith.constant 0 : index
    %c0_8 = arith.constant 0 : index
    %6 = vector.load %arg4[%c0_5, %c0_6, %c0_7, %c0_8] : memref<1x1x64x1xf32, #tpu.memory_space<vmem>>, vector<1x1x64x1xf32>
    %7 = vector.shape_cast %6 : vector<1x1x64x1xf32> to vector<64x1xf32>
    %8 = vector.shape_cast %5 : vector<64x1xf32> to vector<1x1x64x1xf32>
    tpu.vector_store %arg4[%c0_5, %c0_6, %c0_7, %c0_8], %8 {strides = array<i32>} : memref<1x1x64x1xf32, #tpu.memory_space<vmem>>, vector<1x1x64x1xf32>,
    %9 = arith.mulf %3, %3 : vector<64x1024xf32>
    %cst_9 = arith.constant dense<0.000000e+00> : vector<64xf32>
    %10 = vector.multi_reduction <add>, %9, %cst_9 [1] : vector<64x1024xf32> to vector<64xf32>
    %11 = vector.shape_cast %10 : vector<64xf32> to vector<64x1xf32>
    %c0_10 = arith.constant 0 : index
    %c0_11 = arith.constant 0 : index
    %c0_12 = arith.constant 0 : index
    %c0_13 = arith.constant 0 : index
    %12 = vector.load %arg5[%c0_10, %c0_11, %c0_12, %c0_13] : memref<1x1x64x1xf32, #tpu.memory_space<vmem>>, vector<1x1x64x1xf32>
    %13 = vector.shape_cast %12 : vector<1x1x64x1xf32> to vector<64x1xf32>
    %14 = vector.shape_cast %11 : vector<64x1xf32> to vector<1x1x64x1xf32>
    tpu.vector_store %arg5[%c0_10, %c0_11, %c0_12, %c0_13], %14 {strides = array<i32>} : memref<1x1x64x1xf32, #tpu.memory_space<vmem>>, vector<1x1x64x1xf32>,
    return
  }
  func.func @transform_0(%arg0: i32, %arg1: i32) -> (i32, i32, i32) {
    %c0_i32 = arith.constant 0 : i32
    %c0_i32_0 = arith.constant 0 : i32
    return %arg0, %c0_i32, %arg1 : i32, i32, i32
  }
  func.func @transform_1(%arg0: i32, %arg1: i32) -> (i32, i32) {
    %c0_i32 = arith.constant 0 : i32
    %c0_i32_0 = arith.constant 0 : i32
    %c0_i32_1 = arith.constant 0 : i32
    return %c0_i32, %c0_i32_0 : i32, i32
  }
  func.func @transform_2(%arg0: i32, %arg1: i32) -> (i32, i32, i32, i32) {
    %c0_i32 = arith.constant 0 : i32
    %c0_i32_0 = arith.constant 0 : i32
    %c0_i32_1 = arith.constant 0 : i32
    return %arg0, %arg1, %c0_i32, %c0_i32_0 : i32, i32, i32, i32
  }
  func.func @transform_3(%arg0: i32, %arg1: i32) -> (i32, i32, i32, i32) {
    %c0_i32 = arith.constant 0 : i32
    %c0_i32_0 = arith.constant 0 : i32
    %c0_i32_1 = arith.constant 0 : i32
    return %arg0, %arg1, %c0_i32, %c0_i32_0 : i32, i32, i32, i32
  }
}

module attributes {stable_mosaic.version = 11 : i64} {
  func.func @_trans_offset_kernel(%arg0: i32, %arg1: i32, %arg2: memref<1x64x1024xbf16, #tpu.memory_space<vmem>>, %arg3: memref<64x64xbf16, #tpu.memory_space<vmem>>, %arg4: memref<64x1xf32, #tpu.memory_space<vmem>>, %arg5: memref<3x64xbf16, #tpu.memory_space<vmem>>, %arg6: memref<1x3x1024xf32, #tpu.memory_space<vmem>>) attributes {dimension_semantics = [#tpu.dimension_semantics<parallel>, #tpu.dimension_semantics<parallel>], iteration_bounds = array<i64: 2, 1>, scalar_prefetch = 0 : i64, scratch_operands = 0 : i64, tpu.core_type = #tpu.core_type<tc>, window_params = [{transform_indices = @transform_0, window_bounds = array<i64: 1, 64, 1024>}, {pipeline_mode = #tpu.pipeline_mode<synchronous>, transform_indices = @transform_1, window_bounds = array<i64: 64, 64>}, {pipeline_mode = #tpu.pipeline_mode<synchronous>, transform_indices = @transform_2, window_bounds = array<i64: 64, 1>}, {pipeline_mode = #tpu.pipeline_mode<synchronous>, transform_indices = @transform_3, window_bounds = array<i64: 3, 64>}, {transform_indices = @transform_4, window_bounds = array<i64: 1, 3, 1024>}]} {
    %c0 = arith.constant 0 : index
    %c0_0 = arith.constant 0 : index
    %0 = vector.load %arg3[%c0, %c0_0] : memref<64x64xbf16, #tpu.memory_space<vmem>>, vector<64x64xbf16>
    %c0_1 = arith.constant 0 : index
    %c0_2 = arith.constant 0 : index
    %c0_3 = arith.constant 0 : index
    %1 = vector.load %arg2[%c0_1, %c0_2, %c0_3] : memref<1x64x1024xbf16, #tpu.memory_space<vmem>>, vector<1x64x1024xbf16>
    %2 = vector.shape_cast %1 : vector<1x64x1024xbf16> to vector<64x1024xbf16>
    %cst = arith.constant dense<0.000000e+00> : vector<64x1024xf32>
    %3 = tpu.matmul %0, %2, %cst {dimension_numbers = #tpu.dot_dimension_numbers<[1], [0], [0], [1], [0, 0, 1, 1], [], []>} : vector<64x64xbf16>, vector<64x1024xbf16>, vector<64x1024xf32> -> vector<64x1024xf32>
    %c0_4 = arith.constant 0 : index
    %c0_5 = arith.constant 0 : index
    %4 = vector.load %arg4[%c0_4, %c0_5] : memref<64x1xf32, #tpu.memory_space<vmem>>, vector<64x1xf32>
    %5 = vector.broadcast %4 : vector<64x1xf32> to vector<64x1024xf32>
    %6 = arith.addf %3, %5 : vector<64x1024xf32>
    %cst_6 = arith.constant 0.000000e+00 : f32
    %7 = vector.broadcast %cst_6 : f32 to vector<64x1024xf32>
    %8 = arith.maximumf %6, %7 : vector<64x1024xf32>
    %c0_7 = arith.constant 0 : index
    %c0_8 = arith.constant 0 : index
    %9 = vector.load %arg5[%c0_7, %c0_8] : memref<3x64xbf16, #tpu.memory_space<vmem>>, vector<3x64xbf16>
    %10 = arith.truncf %8 : vector<64x1024xf32> to vector<64x1024xbf16>
    %cst_9 = arith.constant dense<0.000000e+00> : vector<3x1024xf32>
    %11 = tpu.matmul %9, %10, %cst_9 {dimension_numbers = #tpu.dot_dimension_numbers<[1], [0], [0], [1], [0, 0, 1, 1], [], []>} : vector<3x64xbf16>, vector<64x1024xbf16>, vector<3x1024xf32> -> vector<3x1024xf32>
    %12 = math.tanh %11 : vector<3x1024xf32>
    %c0_10 = arith.constant 0 : index
    %c0_11 = arith.constant 0 : index
    %c0_12 = arith.constant 0 : index
    %13 = vector.load %arg6[%c0_10, %c0_11, %c0_12] : memref<1x3x1024xf32, #tpu.memory_space<vmem>>, vector<1x3x1024xf32>
    %14 = vector.shape_cast %13 : vector<1x3x1024xf32> to vector<3x1024xf32>
    %15 = vector.shape_cast %12 : vector<3x1024xf32> to vector<1x3x1024xf32>
    tpu.vector_store %arg6[%c0_10, %c0_11, %c0_12], %15 {strides = array<i32>} : memref<1x3x1024xf32, #tpu.memory_space<vmem>>, vector<1x3x1024xf32>,
    return
  }
  func.func @transform_0(%arg0: i32, %arg1: i32) -> (i32, i32, i32) {
    %c0_i32 = arith.constant 0 : i32
    %c0_i32_0 = arith.constant 0 : i32
    return %arg0, %c0_i32, %arg1 : i32, i32, i32
  }
  func.func @transform_1(%arg0: i32, %arg1: i32) -> (i32, i32) {
    %c0_i32 = arith.constant 0 : i32
    %c0_i32_0 = arith.constant 0 : i32
    %c0_i32_1 = arith.constant 0 : i32
    return %c0_i32, %c0_i32_0 : i32, i32
  }
  func.func @transform_2(%arg0: i32, %arg1: i32) -> (i32, i32) {
    %c0_i32 = arith.constant 0 : i32
    %c0_i32_0 = arith.constant 0 : i32
    %c0_i32_1 = arith.constant 0 : i32
    return %c0_i32, %c0_i32_0 : i32, i32
  }
  func.func @transform_3(%arg0: i32, %arg1: i32) -> (i32, i32) {
    %c0_i32 = arith.constant 0 : i32
    %c0_i32_0 = arith.constant 0 : i32
    %c0_i32_1 = arith.constant 0 : i32
    return %c0_i32, %c0_i32_0 : i32, i32
  }
  func.func @transform_4(%arg0: i32, %arg1: i32) -> (i32, i32, i32) {
    %c0_i32 = arith.constant 0 : i32
    %c0_i32_0 = arith.constant 0 : i32
    return %arg0, %c0_i32, %arg1 : i32, i32, i32
  }
}

module attributes {stable_mosaic.version = 11 : i64} {
  func.func @_residual_fused_kernel(%arg0: i32, %arg1: memref<64x32xbf16, #tpu.memory_space<vmem>>, %arg2: memref<64x64xbf16, #tpu.memory_space<vmem>>, %arg3: memref<64x1xf32, #tpu.memory_space<vmem>>, %arg4: memref<64x1xf32, #tpu.memory_space<vmem>>, %arg5: memref<64x32xf32, #tpu.memory_space<vmem>>) attributes {dimension_semantics = [#tpu.dimension_semantics<arbitrary>], iteration_bounds = array<i64: 1>, scalar_prefetch = 0 : i64, scratch_operands = 0 : i64, tpu.core_type = #tpu.core_type<tc>, window_params = [{pipeline_mode = #tpu.pipeline_mode<synchronous>, transform_indices = @transform_0, window_bounds = array<i64: 64, 32>}, {pipeline_mode = #tpu.pipeline_mode<synchronous>, transform_indices = @transform_1, window_bounds = array<i64: 64, 64>}, {pipeline_mode = #tpu.pipeline_mode<synchronous>, transform_indices = @transform_2, window_bounds = array<i64: 64, 1>}, {pipeline_mode = #tpu.pipeline_mode<synchronous>, transform_indices = @transform_3, window_bounds = array<i64: 64, 1>}, {pipeline_mode = #tpu.pipeline_mode<synchronous>, transform_indices = @transform_4, window_bounds = array<i64: 64, 32>}]} {
    %c0 = arith.constant 0 : index
    %c0_0 = arith.constant 0 : index
    %0 = vector.load %arg2[%c0, %c0_0] : memref<64x64xbf16, #tpu.memory_space<vmem>>, vector<64x64xbf16>
    %c0_1 = arith.constant 0 : index
    %c0_2 = arith.constant 0 : index
    %1 = vector.load %arg1[%c0_1, %c0_2] : memref<64x32xbf16, #tpu.memory_space<vmem>>, vector<64x32xbf16>
    %cst = arith.constant dense<0.000000e+00> : vector<64x32xf32>
    %2 = tpu.matmul %0, %1, %cst {dimension_numbers = #tpu.dot_dimension_numbers<[1], [0], [0], [1], [0, 0, 1, 1], [], []>} : vector<64x64xbf16>, vector<64x32xbf16>, vector<64x32xf32> -> vector<64x32xf32>
    %cst_3 = arith.constant dense<0.000000e+00> : vector<64xf32>
    %3 = vector.multi_reduction <add>, %2, %cst_3 [1] : vector<64x32xf32> to vector<64xf32>
    %4 = vector.shape_cast %3 : vector<64xf32> to vector<64x1xf32>
    %cst_4 = arith.constant 3.125000e-02 : f32
    %5 = vector.broadcast %cst_4 : f32 to vector<64x1xf32>
    %6 = arith.mulf %4, %5 : vector<64x1xf32>
    %7 = arith.mulf %2, %2 : vector<64x32xf32>
    %cst_5 = arith.constant dense<0.000000e+00> : vector<64xf32>
    %8 = vector.multi_reduction <add>, %7, %cst_5 [1] : vector<64x32xf32> to vector<64xf32>
    %9 = vector.shape_cast %8 : vector<64xf32> to vector<64x1xf32>
    %cst_6 = arith.constant 3.125000e-02 : f32
    %10 = vector.broadcast %cst_6 : f32 to vector<64x1xf32>
    %11 = arith.mulf %9, %10 : vector<64x1xf32>
    %12 = arith.mulf %6, %6 : vector<64x1xf32>
    %13 = arith.subf %11, %12 : vector<64x1xf32>
    %cst_7 = arith.constant 0.000000e+00 : f32
    %14 = vector.broadcast %cst_7 : f32 to vector<64x1xf32>
    %15 = arith.maximumf %13, %14 : vector<64x1xf32>
    %c0_8 = arith.constant 0 : index
    %c0_9 = arith.constant 0 : index
    %16 = vector.load %arg3[%c0_8, %c0_9] : memref<64x1xf32, #tpu.memory_space<vmem>>, vector<64x1xf32>
    %cst_10 = arith.constant 9.99999974E-6 : f32
    %17 = vector.broadcast %cst_10 : f32 to vector<64x1xf32>
    %18 = arith.addf %15, %17 : vector<64x1xf32>
    %19 = math.rsqrt %18 : vector<64x1xf32>
    %20 = arith.mulf %16, %19 : vector<64x1xf32>
    %c0_11 = arith.constant 0 : index
    %c0_12 = arith.constant 0 : index
    %21 = vector.load %arg4[%c0_11, %c0_12] : memref<64x1xf32, #tpu.memory_space<vmem>>, vector<64x1xf32>
    %22 = arith.mulf %6, %20 : vector<64x1xf32>
    %23 = arith.subf %21, %22 : vector<64x1xf32>
    %24 = vector.broadcast %20 : vector<64x1xf32> to vector<64x32xf32>
    %25 = arith.mulf %2, %24 : vector<64x32xf32>
    %26 = vector.broadcast %23 : vector<64x1xf32> to vector<64x32xf32>
    %27 = arith.addf %25, %26 : vector<64x32xf32>
    %cst_13 = arith.constant 0.000000e+00 : f32
    %28 = vector.broadcast %cst_13 : f32 to vector<64x32xf32>
    %29 = arith.maximumf %27, %28 : vector<64x32xf32>
    %c0_14 = arith.constant 0 : index
    %c0_15 = arith.constant 0 : index
    %30 = vector.load %arg5[%c0_14, %c0_15] : memref<64x32xf32, #tpu.memory_space<vmem>>, vector<64x32xf32>
    tpu.vector_store %arg5[%c0_14, %c0_15], %29 {strides = array<i32>} : memref<64x32xf32, #tpu.memory_space<vmem>>, vector<64x32xf32>,
    return
  }
  func.func @transform_0(%arg0: i32) -> (i32, i32) {
    %c0_i32 = arith.constant 0 : i32
    %c0_i32_0 = arith.constant 0 : i32
    %c0_i32_1 = arith.constant 0 : i32
    return %c0_i32, %c0_i32_0 : i32, i32
  }
  func.func @transform_1(%arg0: i32) -> (i32, i32) {
    %c0_i32 = arith.constant 0 : i32
    %c0_i32_0 = arith.constant 0 : i32
    %c0_i32_1 = arith.constant 0 : i32
    return %c0_i32, %c0_i32_0 : i32, i32
  }
  func.func @transform_2(%arg0: i32) -> (i32, i32) {
    %c0_i32 = arith.constant 0 : i32
    %c0_i32_0 = arith.constant 0 : i32
    %c0_i32_1 = arith.constant 0 : i32
    return %c0_i32, %c0_i32_0 : i32, i32
  }
  func.func @transform_3(%arg0: i32) -> (i32, i32) {
    %c0_i32 = arith.constant 0 : i32
    %c0_i32_0 = arith.constant 0 : i32
    %c0_i32_1 = arith.constant 0 : i32
    return %c0_i32, %c0_i32_0 : i32, i32
  }
  func.func @transform_4(%arg0: i32) -> (i32, i32) {
    %c0_i32 = arith.constant 0 : i32
    %c0_i32_0 = arith.constant 0 : i32
    %c0_i32_1 = arith.constant 0 : i32
    return %c0_i32, %c0_i32_0 : i32, i32
  }
}

</mosaic_0001>

<bundles_post_ra>
// kernel: custom-call.8
= control target key start
LH: loop header
LB: loop body
LE: loop exit
PB: predicated region body
PF: predicated region fallthrough
CT: control target
= control target key end

     0   :  { %s6_s0 = inlined_call_operand.vmem [shape: f32[2,256], index: 0, kind: output, shape index: {}]  }

// kernel: adapt_layer_off_forward.3
= control target key start
LH: loop header
LB: loop body
LE: loop exit
PB: predicated region body
PF: predicated region fallthrough
CT: control target
= control target key end

     0   :  { %s1361_s12 = smov 0   ;;  %s1363_s13 = smov 0   ;;  %s1683_s0 = inlined_call_operand.vmem [shape: bf16[2,64,1024], index: 0, kind: input, shape index: {}]   ;;  %s1684_s1 = inlined_call_operand.vmem [shape: bf16[64,64], index: 1, kind: input, shape index: {}]   ;;  %s1685_s2 = inlined_call_operand.vmem [shape: f32[2,1,64,1], index: 2, kind: output, shape index: {0}]   ;;  %s1686_s3 = inlined_call_operand.vmem [shape: f32[2,1,64,1], index: 3, kind: output, shape index: {1}]  }
   0x1   :  { %s1365_s14 = smov 0  }
   0x2 LB: > { %s26_s15 = sadd.s32 1, %s1335_s13  ;;  %p1069_p0 = scmp.ge.s32.totalorder %s1339_s14, 1  ;;  %s1339_s14 = sphi %s1365_s14, %s14_s14   ;;  %s1335_s13 = sphi %s1363_s13, %s1688_s13   ;;  %s1331_s12 = sphi %s1361_s12, %s1687_s12  }
   0x3   : > { %p28_p1 = scmp.ge.s32.totalorder %s26_s15, 2  ;;  %p163_p2 = scmp.lt.s32.totalorder %s1339_s14, 3 }
   0x5   : > { %s1690_s15 = smov (%p28_p1, %s26_s15), 0  ;;  %p164_p3 = pnand %p1069_p0, %p163_p2 }
   0x6   : > { %p205_p4 = scmp.lt.s32.totalorder (!%p164_p3), %s1331_s12, 1 }
   0x7   : > { %167 = sbr.rel (%p164_p3) target bundleno = 416 (0x1a0), region = 28 }
   0xc   : > { %s1692_s12 = smov (!%p205_p4, %s1331_s12), 1  ;;  %v1424_v49 = vld [vmem:[%s1684_s1] sm:$0xff]  ;;  %vm453_vm0 = vcmask 523264   ;;  %vm770_vm1 = vcmask 7168  }
   0xd   : > { %s1254_s16 = sshll.u32 %s1692_s12, 8  ;;  %s1255_s28 = sshll.u32 %s1692_s12, 6 }
   0xe   : > { %s1385_s19 = scalar_lea.vmem %s1683_s0, %s1254_s16  ;;  %s222_s4 = scalar_lea.vmem %s1685_s2, %s1255_s28 }
   0xf   : > { %v1190_v0 = vld [vmem:[%s1385_s19 + $0xc0] sm:$0xf]  ;;  %v1285_v2 = vld [vmem:[%s1385_s19 + $0xc4] sm:$0xf]  ;;  %v1198_v5 = vld [vmem:[%s1385_s19 + $0xc8] sm:$0xf]  ;;  %s1648_s7 = scalar_lea.vmem %s1686_s3, %s1255_s28 }
  0x10   : > { %v1289_v1 = vld [vmem:[%s1385_s19 + $0xdc] sm:$0xf0]  ;;  %v1192_v4 = vld [vmem:[%s1385_s19 + $0xe0] sm:$0xf0]  ;;  %v1290_v6 = vld [vmem:[%s1385_s19 + $0xe4] sm:$0xf0] }
  0x11   : > { %v1191_v3 = vor.u32 %v1289_v1, %v1190_v0  ;;  %v1195_v7 = vor.u32 %v1285_v2, %v1192_v4  ;;  %v1199_v8 = vor.u32 %v1290_v6, %v1198_v5  ;;  %v1286_v9 = vld [vmem:[%s1385_s19 + $0xcc] sm:$0xf]  ;;  %v1158_v11 = vld [vmem:[%s1385_s19 + $0x80] sm:$0xf]  ;;  %v1277_v14 = vld [vmem:[%s1385_s19 + $0x84] sm:$0xf] }
  0x12   : > { %v1200_v10 = vld [vmem:[%s1385_s19 + $0xe8] sm:$0xf0]  ;;  %v1281_v13 = vld [vmem:[%s1385_s19 + $0x9c] sm:$0xf0]  ;;  %v1160_v15 = vld [vmem:[%s1385_s19 + $0xa0] sm:$0xf0] }
  0x13   : > { %470 = vmatpush.bf16.msra.mxu0 %v1191_v3  ;;  %v1203_v12 = vor.u32 %v1286_v9, %v1200_v10  ;;  %499 = vmatpush.bf16.msra.mxu1 %v1195_v7  ;;  %v1159_v16 = vor.u32 %v1281_v13, %v1158_v11  ;;  %v1163_v17 = vor.u32 %v1277_v14, %v1160_v15  ;;  %v1166_v18 = vld [vmem:[%s1385_s19 + $0x88] sm:$0xf]  ;;  %v1278_v20 = vld [vmem:[%s1385_s19 + $0x8c] sm:$0xf]  ;;  %v1126_v23 = vld [vmem:[%s1385_s19 + $0x40] sm:$0xf] }
  0x14   : > { %528 = vmatpush.bf16.msra.mxu2 %v1199_v8  ;;  %v1282_v19 = vld [vmem:[%s1385_s19 + $0xa4] sm:$0xf0]  ;;  %v1168_v22 = vld [vmem:[%s1385_s19 + $0xa8] sm:$0xf0]  ;;  %v1273_v24 = vld [vmem:[%s1385_s19 + $0x5c] sm:$0xf0] }
  0x15   : > { %557 = vmatpush.bf16.msra.mxu3 %v1203_v12  ;;  %v1167_v21 = vor.u32 %v1282_v19, %v1166_v18  ;;  %v1171_v25 = vor.u32 %v1278_v20, %v1168_v22  ;;  %v1269_v26 = vld [vmem:[%s1385_s19 + $0x44] sm:$0xf]  ;;  %v1134_v28 = vld [vmem:[%s1385_s19 + $0x48] sm:$0xf]  ;;  %v1127_v29 = vor.u32 %v1273_v24, %v1126_v23  ;;  %v1270_v31 = vld [vmem:[%s1385_s19 + $0x4c] sm:$0xf] }
  0x16   : > { %v1128_v27 = vld [vmem:[%s1385_s19 + $0x60] sm:$0xf0]  ;;  %v1274_v30 = vld [vmem:[%s1385_s19 + $0x64] sm:$0xf0]  ;;  %v1136_v32 = vld [vmem:[%s1385_s19 + $0x68] sm:$0xf0] }
  0x17   : > { %471 = vmatpush.bf16.msra.mxu0 %v1159_v16  ;;  %500 = vmatpush.bf16.msra.mxu1 %v1163_v17  ;;  %v1131_v33 = vor.u32 %v1269_v26, %v1128_v27  ;;  %v1135_v34 = vor.u32 %v1274_v30, %v1134_v28  ;;  %v1094_v35 = vld [vmem:[%s1385_s19] sm:$0xf]  ;;  %v1261_v37 = vld [vmem:[%s1385_s19 + $0x4] sm:$0xf]  ;;  %v1139_v38 = vor.u32 %v1270_v31, %v1136_v32  ;;  %v1102_v40 = vld [vmem:[%s1385_s19 + $0x8] sm:$0xf] }
  0x18   : > { %529 = vmatpush.bf16.msra.mxu2 %v1167_v21  ;;  %v1265_v36 = vld [vmem:[%s1385_s19 + $0x1c] sm:$0xf0]  ;;  %v1096_v39 = vld [vmem:[%s1385_s19 + $0x20] sm:$0xf0]  ;;  %v1266_v41 = vld [vmem:[%s1385_s19 + $0x24] sm:$0xf0] }
  0x19   : > { %558 = vmatpush.bf16.msra.mxu3 %v1171_v25  ;;  %v1262_v42 = vld [vmem:[%s1385_s19 + $0xc] sm:$0xf]  ;;  %v1214_v44 = vld [vmem:[%s1385_s19 + $0xd8] sm:$0xf]  ;;  %v1095_v45 = vor.u32 %v1265_v36, %v1094_v35  ;;  %v1099_v47 = vor.u32 %v1261_v37, %v1096_v39  ;;  %v1103_v48 = vor.u32 %v1266_v41, %v1102_v40  ;;  %v1288_v50 = vld [vmem:[%s1385_s19 + $0xdc] sm:$0xf] }
  0x1a   : > { %v1104_v43 = vld [vmem:[%s1385_s19 + $0x28] sm:$0xf0]  ;;  %v1292_v46 = vld [vmem:[%s1385_s19 + $0xf4] sm:$0xf0]  ;;  %v1216_v51 = vld [vmem:[%s1385_s19 + $0xf8] sm:$0xf0] }
  0x1b   : > { %472 = vmatpush.bf16.msra.mxu0 %v1127_v29  ;;  %501 = vmatpush.bf16.msra.mxu1 %v1131_v33  ;;  %v1107_v52 = vor.u32 %v1262_v42, %v1104_v43  ;;  %v1215_v53 = vor.u32 %v1292_v46, %v1214_v44  ;;  %v1206_v54 = vld [vmem:[%s1385_s19 + $0xd0] sm:$0xf]  ;;  %v1287_v56 = vld [vmem:[%s1385_s19 + $0xd4] sm:$0xf]  ;;  %v1219_v57 = vor.u32 %v1288_v50, %v1216_v51  ;;  %v1182_v59 = vld [vmem:[%s1385_s19 + $0x98] sm:$0xf] }
  0x1c   : > { %530 = vmatpush.bf16.msra.mxu2 %v1135_v34  ;;  %v1291_v55 = vld [vmem:[%s1385_s19 + $0xec] sm:$0xf0]  ;;  %v1208_v58 = vld [vmem:[%s1385_s19 + $0xf0] sm:$0xf0]  ;;  %v1284_v60 = vld [vmem:[%s1385_s19 + $0xb4] sm:$0xf0] }
  0x1d   : > { %559 = vmatpush.bf16.msra.mxu3 %v1139_v38  ;;  %v1280_v61 = vld [vmem:[%s1385_s19 + $0x9c] sm:$0xf]  ;;  %v1207_v63 = vor.u32 %v1291_v55, %v1206_v54  ;;  %v1211_v0 = vor.u32 %v1287_v56, %v1208_v58  ;;  %v1183_v1 = vor.u32 %v1284_v60, %v1182_v59  ;;  %v1174_v2 = vld [vmem:[%s1385_s19 + $0x90] sm:$0xf]  ;;  %v1279_v5 = vld [vmem:[%s1385_s19 + $0x94] sm:$0xf] }
  0x1e   : > { %v1184_v62 = vld [vmem:[%s1385_s19 + $0xb8] sm:$0xf0]  ;;  %v1283_v3 = vld [vmem:[%s1385_s19 + $0xac] sm:$0xf0]  ;;  %v1176_v6 = vld [vmem:[%s1385_s19 + $0xb0] sm:$0xf0] }
  0x1f   : > { %473 = vmatpush.bf16.msra.mxu0 %v1095_v45  ;;  %502 = vmatpush.bf16.msra.mxu1 %v1099_v47  ;;  %v1187_v4 = vor.u32 %v1280_v61, %v1184_v62  ;;  %v1175_v7 = vor.u32 %v1283_v3, %v1174_v2  ;;  %v1150_v8 = vld [vmem:[%s1385_s19 + $0x58] sm:$0xf]  ;;  %v1142_v10 = vld [vmem:[%s1385_s19 + $0x50] sm:$0xf]  ;;  %v1179_v11 = vor.u32 %v1279_v5, %v1176_v6  ;;  %v1272_v14 = vld [vmem:[%s1385_s19 + $0x5c] sm:$0xf] }
  0x20   : > { %531 = vmatpush.bf16.msra.mxu2 %v1103_v48  ;;  %v1276_v9 = vld [vmem:[%s1385_s19 + $0x74] sm:$0xf0]  ;;  %v1275_v13 = vld [vmem:[%s1385_s19 + $0x6c] sm:$0xf0]  ;;  %v1152_v15 = vld [vmem:[%s1385_s19 + $0x78] sm:$0xf0] }
  0x21   : > { %560 = vmatpush.bf16.msra.mxu3 %v1107_v52  ;;  %v1151_v12 = vor.u32 %v1276_v9, %v1150_v8  ;;  %v1155_v16 = vor.u32 %v1272_v14, %v1152_v15  ;;  %v1271_v17 = vld [vmem:[%s1385_s19 + $0x54] sm:$0xf]  ;;  %v1143_v19 = vor.u32 %v1275_v13, %v1142_v10  ;;  %v1258_v21 = vld [vmem:[%s1684_s1 + $0x8] sm:$0xff]  ;;  %v1118_v22 = vld [vmem:[%s1385_s19 + $0x18] sm:$0xf] }
  0x22   : > { %1220 = vmatmul.msk.bf16.vlgmr.msra.gmra.mxu0 %vm453_vm0, %v1424_v49  ;;  %1224 = vmatmul.msk.bf16.vlgmr.msra.gmra.mxu1 %vm453_vm0, %v1424_v49  ;;  %v1144_v18 = vld [vmem:[%s1385_s19 + $0x70] sm:$0xf0]  ;;  %v1268_v23 = vld [vmem:[%s1385_s19 + $0x34] sm:$0xf0]  ;;  %v1110_v24 = vld [vmem:[%s1385_s19 + $0x10] sm:$0xf] }
  0x23   : > { %1228 = vmatmul.msk.bf16.vlgmr.msra.gmra.mxu2 %vm453_vm0, %v1424_v49  ;;  %586 = vmatpush.bf16.msrb.mxu0 %v1207_v63  ;;  %v1147_v20 = vor.u32 %v1271_v17, %v1144_v18  ;;  %v1119_v25 = vor.u32 %v1268_v23, %v1118_v22  ;;  %v1267_v26 = vld [vmem:[%s1385_s19 + $0x2c] sm:$0xf0]  ;;  %v1264_v27 = vld [vmem:[%s1385_s19 + $0x1c] sm:$0xf]  ;;  %v1263_v31 = vld [vmem:[%s1385_s19 + $0x14] sm:$0xf] }
  0x24   : > { %644 = vmatpush.bf16.msrb.mxu2 %v1215_v53  ;;  %1232 = vmatmul.msk.bf16.vlgmr.msra.gmra.mxu3 %vm453_vm0, %v1424_v49  ;;  %v1120_v28 = vld [vmem:[%s1385_s19 + $0x38] sm:$0xf0]  ;;  %v1111_v29 = vor.u32 %v1267_v26, %v1110_v24  ;;  %v1112_v32 = vld [vmem:[%s1385_s19 + $0x30] sm:$0xf0] }
  0x25   : > { %673 = vmatpush.bf16.msrb.mxu3 %v1219_v57  ;;  %615 = vmatpush.bf16.msrb.mxu1 %v1211_v0  ;;  %v1123_v30 = vor.u32 %v1264_v27, %v1120_v28  ;;  %v1115_v33 = vor.u32 %v1263_v31, %v1112_v32  ;;  %v1259_v34 = vld [vmem:[%s1684_s1 + $0x10] sm:$0xff]  ;;  %v1260_v35 = vld [vmem:[%s1684_s1 + $0x18] sm:$0xff] }
  0x27   : > { %587 = vmatpush.bf16.msrb.mxu0 %v1175_v7 }
  0x28   : > { %645 = vmatpush.bf16.msrb.mxu2 %v1183_v1 }
  0x29   : > { %674 = vmatpush.bf16.msrb.mxu3 %v1187_v4  ;;  %616 = vmatpush.bf16.msrb.mxu1 %v1179_v11 }
  0x2b   : > { %588 = vmatpush.bf16.msrb.mxu0 %v1143_v19 }
  0x2c   : > { %646 = vmatpush.bf16.msrb.mxu2 %v1151_v12 }
  0x2d   : > { %675 = vmatpush.bf16.msrb.mxu3 %v1155_v16  ;;  %617 = vmatpush.bf16.msrb.mxu1 %v1147_v20 }
  0x2f   : > { %589 = vmatpush.bf16.msrb.mxu0 %v1111_v29 }
  0x30   : > { %647 = vmatpush.bf16.msrb.mxu2 %v1119_v25 }
  0x31   : > { %676 = vmatpush.bf16.msrb.mxu3 %v1123_v30  ;;  %618 = vmatpush.bf16.msrb.mxu1 %v1115_v33 }
  0x32   : > { %1221 = vmatmul.msk.bf16.gmra.mxu0 %vm453_vm0, %v1258_v21  ;;  %1225 = vmatmul.msk.bf16.gmra.mxu1 %vm453_vm0, %v1258_v21 }
  0x33   : > { %1229 = vmatmul.msk.bf16.gmra.mxu2 %vm453_vm0, %v1258_v21 }
  0x34   : > { %1233 = vmatmul.msk.bf16.gmra.mxu3 %vm453_vm0, %v1258_v21 }
  0x42   : > { %1222 = vmatmul.msk.bf16.gmra.mxu0 %vm453_vm0, %v1259_v34  ;;  %1226 = vmatmul.msk.bf16.gmra.mxu1 %vm453_vm0, %v1259_v34 }
  0x43   : > { %1230 = vmatmul.msk.bf16.gmra.mxu2 %vm453_vm0, %v1259_v34 }
  0x44   : > { %1234 = vmatmul.msk.bf16.gmra.mxu3 %vm453_vm0, %v1259_v34 }
  0x52   : > { %1223 = vmatmul.msk.bf16.gmra.mxu0 %vm453_vm0, %v1260_v35  ;;  %1227 = vmatmul.msk.bf16.gmra.mxu1 %vm453_vm0, %v1260_v35 }
  0x53   : > { %1231 = vmatmul.msk.bf16.gmra.mxu2 %vm453_vm0, %v1260_v35 }
  0x54   : > { %1235 = vmatmul.msk.bf16.gmra.mxu3 %vm453_vm0, %v1260_v35 }
  0x62   : > { %1236 = vmatmul.msk.bf16.vlgmr.msrb.gmra.mxu0 %vm453_vm0, %v1424_v49  ;;  %1240 = vmatmul.msk.bf16.vlgmr.msrb.gmra.mxu1 %vm453_vm0, %v1424_v49 }
  0x63   : > { %1244 = vmatmul.msk.bf16.vlgmr.msrb.gmra.mxu2 %vm453_vm0, %v1424_v49 }
  0x64   : > { %1248 = vmatmul.msk.bf16.vlgmr.msrb.gmra.mxu3 %vm453_vm0, %v1424_v49 }
  0x72   : > { %1237 = vmatmul.msk.bf16.gmra.mxu0 %vm453_vm0, %v1258_v21  ;;  %1241 = vmatmul.msk.bf16.gmra.mxu1 %vm453_vm0, %v1258_v21 }
  0x73   : > { %1245 = vmatmul.msk.bf16.gmra.mxu2 %vm453_vm0, %v1258_v21 }
  0x74   : > { %1249 = vmatmul.msk.bf16.gmra.mxu3 %vm453_vm0, %v1258_v21 }
  0x82   : > { %1238 = vmatmul.msk.bf16.gmra.mxu0 %vm453_vm0, %v1259_v34  ;;  %1242 = vmatmul.msk.bf16.gmra.mxu1 %vm453_vm0, %v1259_v34 }
  0x83   : > { %1246 = vmatmul.msk.bf16.gmra.mxu2 %vm453_vm0, %v1259_v34 }
  0x84   : > { %1250 = vmatmul.msk.bf16.gmra.mxu3 %vm453_vm0, %v1259_v34 }
  0x92   : > { %1239 = vmatmul.msk.bf16.gmra.mxu0 %vm453_vm0, %v1260_v35  ;;  %1243 = vmatmul.msk.bf16.gmra.mxu1 %vm453_vm0, %v1260_v35 }
  0x93   : > { %1247 = vmatmul.msk.bf16.gmra.mxu2 %vm453_vm0, %v1260_v35 }
  0x94   : > { %1251 = vmatmul.msk.bf16.gmra.mxu3 %vm453_vm0, %v1260_v35 }
  0x9f   : > { %v475_v36 = vpop.f32.mrf.mxu0  ;;  %v504_v37 = vpop.f32.mrf.mxu1 }
  0xa0   : > { %v779_v9 = vmul.f32 %v475_v36, %v475_v36  ;;  %v780_v10 = vmul.f32 %v504_v37, %v504_v37  ;;  %v698_v14 = vadd.f32 %v504_v37, %v475_v36 }
  0xa2   : > { %v843_v16 = vadd.f32 %v780_v10, %v779_v9 }
  0xa6   : > { %v533_v38 = vpop.f32.mrf.mxu2 }
  0xa7   : > { %v562_v39 = vpop.f32.mrf.mxu3  ;;  %v477_v40 = vpop.f32.mrf.mxu0  ;;  %v781_v15 = vmul.f32 %v533_v38, %v533_v38  ;;  %v699_v17 = vadd.f32 %v698_v14, %v533_v38 }
  0xa8   : > { %v506_v41 = vpop.f32.mrf.mxu1  ;;  %v782_v19 = vmul.f32 %v562_v39, %v562_v39  ;;  %v787_v29 = vmul.f32 %v477_v40, %v477_v40 }
  0xa9   : > { %v844_v18 = vadd.f32 %v843_v16, %v781_v15  ;;  %v700_v21 = vadd.f32 %v699_v17, %v562_v39  ;;  %v707_v27 = vadd.f32 %v506_v41, %v477_v40  ;;  %v788_v30 = vmul.f32 %v506_v41, %v506_v41 }
  0xab   : > { %v845_v26 = vadd.f32 %v844_v18, %v782_v19  ;;  %v852_v36 = vadd.f32 %v788_v30, %v787_v29 }
  0xae   : > { %v535_v42 = vpop.f32.mrf.mxu2 }
  0xaf   : > { %v1505_v43 = vpop.f32.mrf.mxu3  ;;  %v1507_v44 = vpop.f32.mrf.mxu0  ;;  %v708_v31 = vadd.f32 %v707_v27, %v535_v42  ;;  %v789_v34 = vmul.f32 %v535_v42, %v535_v42 }
  0xb0   : > { %v1509_v45 = vpop.f32.mrf.mxu1  ;;  %v795_v42 = vmul.f32 %v1507_v44, %v1507_v44  ;;  %v790_v14 = vmul.f32 %v1505_v43, %v1505_v43 }
  0xb1   : > { %v709_v38 = vadd.f32 %v708_v31, %v1505_v43  ;;  %v716_v40 = vadd.f32 %v1509_v45, %v1507_v44  ;;  %v796_v10 = vmul.f32 %v1509_v45, %v1509_v45 }
  0xb6   : > { %v1511_v46 = vpop.f32.mrf.mxu2 }
  0xb7   : > { %v1513_v47 = vpop.f32.mrf.mxu3  ;;  %v1515_v48 = vpop.f32.mrf.mxu0  ;;  %v717_v15 = vadd.f32 %v716_v40, %v1511_v46  ;;  %v797_v18 = vmul.f32 %v1511_v46, %v1511_v46 }
  0xb8   : > { %v1517_v49 = vpop.f32.mrf.mxu1  ;;  %v803_v44 = vmul.f32 %v1515_v48, %v1515_v48  ;;  %v798_v46 = vmul.f32 %v1513_v47, %v1513_v47 }
  0xb9   : > { %v725_v50 = vadd.f32 %v1517_v49, %v1515_v48  ;;  %v718_v45 = vadd.f32 %v717_v15, %v1513_v47  ;;  %v804_v43 = vmul.f32 %v1517_v49, %v1517_v49 }
  0xbe   : > { %v1521_v51 = vpop.f32.mrf.mxu2 }
  0xbf   : > { %v726_v52 = vadd.f32 %v725_v50, %v1521_v51  ;;  %v1524_v53 = vpop.f32.mrf.mxu3  ;;  %v1526_v54 = vpop.f32.mrf.mxu0  ;;  %v805_v30 = vmul.f32 %v1521_v51, %v1521_v51 }
  0xc0   : > { %v1528_v55 = vpop.f32.mrf.mxu1  ;;  %v811_v47 = vmul.f32 %v1526_v54, %v1526_v54 }
  0xc1   : > { %v1531_v56 = vadd.f32 %v726_v52, %v1524_v53  ;;  %v812_v51 = vmul.f32 %v1528_v55, %v1528_v55 }
  0xc6   : > { %v1533_v57 = vpop.f32.mrf.mxu2 }
  0xc7   : > { %v1535_v58 = vpop.f32.mrf.mxu3  ;;  %v1537_v59 = vpop.f32.mrf.mxu0 }
  0xc8   : > { %v819_v60 = vmul.f32 %v1537_v59, %v1537_v59  ;;  %v1541_v61 = vpop.f32.mrf.mxu1 }
  0xc9   : > { %v820_v62 = vmul.f32 %v1541_v61, %v1541_v61 }
  0xcb   : > { %v888_v63 = vadd.f32 %v820_v62, %v819_v60 }
  0xce   : > { %v1545_v0 = vpop.f32.mrf.mxu2 }
  0xcf   : > { %v821_v1 = vmul.f32 %v1545_v0, %v1545_v0  ;;  %v1549_v2 = vpop.f32.mrf.mxu3  ;;  %v1551_v3 = vpop.f32.mrf.mxu0 }
  0xd0   : > { %v1553_v4 = vpop.f32.mrf.mxu1  ;;  %v822_v6 = vmul.f32 %v1549_v2, %v1549_v2 }
  0xd1   : > { %v889_v5 = vadd.f32 %v888_v63, %v821_v1  ;;  %v853_v63 = vadd.f32 %v852_v36, %v789_v34 }
  0xd3   : > { %v1557_v7 = vadd.f32 %v889_v5, %v822_v6  ;;  %v854_v19 = vadd.f32 %v853_v63, %v790_v14 }
  0xd6   : > { %v1559_v8 = vpop.f32.mrf.mxu2 }
  0xd7   : > { %v1561_v11 = vpop.f32.mrf.mxu3  ;;  %v1563_v12 = vpop.f32.mrf.mxu0 }
  0xd8   : > { %v1565_v13 = vpop.f32.mrf.mxu1 }
  0xde   : > { %v1567_v20 = vpop.f32.mrf.mxu2 }
  0xdf   : > { %v1569_v22 = vpop.f32.mrf.mxu3  ;;  %v591_v23 = vpop.f32.mrf.mxu0 }
  0xe0   : > { %v783_v24 = vmul.f32 %v591_v23, %v591_v23  ;;  %v620_v25 = vpop.f32.mrf.mxu1  ;;  %v701_v28 = vadd.f32 %v700_v21, %v591_v23  ;;  %v861_v23 = vadd.f32 %v796_v10, %v795_v42 }
  0xe1   : > { %v784_v33 = vmul.f32 %v620_v25, %v620_v25 }
  0xe2   : > { %v846_v32 = vadd.f32 %v845_v26, %v783_v24  ;;  %v702_v35 = vadd.f32 %v701_v28, %v620_v25  ;;  %v862_v29 = vadd.f32 %v861_v23, %v797_v18 }
  0xe4   : > { %v847_v39 = vadd.f32 %v846_v32, %v784_v33  ;;  %v863_v49 = vadd.f32 %v862_v29, %v798_v46  ;;  %v743_v46 = vadd.f32 %v1541_v61, %v1537_v59  ;;  %v827_v59 = vmul.f32 %v1551_v3, %v1551_v3 }
  0xe6   : > { %v649_v37 = vpop.f32.mrf.mxu2 }
  0xe7   : > { %v703_v50 = vadd.f32 %v702_v35, %v649_v37  ;;  %v785_v52 = vmul.f32 %v649_v37, %v649_v37  ;;  %v678_v60 = vpop.f32.mrf.mxu3  ;;  %v593_v62 = vpop.f32.mrf.mxu0  ;;  %v870_v35 = vadd.f32 %v804_v43, %v803_v44 }
  0xe8   : > { %v786_v1 = vmul.f32 %v678_v60, %v678_v60  ;;  %v622_v5 = vpop.f32.mrf.mxu1  ;;  %v710_v41 = vadd.f32 %v709_v38, %v593_v62  ;;  %v791_v16 = vmul.f32 %v593_v62, %v593_v62 }
  0xe9   : > { %v704_v6 = vadd.f32 %v703_v50, %v678_v60  ;;  %v848_v9 = vadd.f32 %v847_v39, %v785_v52  ;;  %v792_v32 = vmul.f32 %v622_v5, %v622_v5  ;;  %v871_v38 = vadd.f32 %v870_v35, %v805_v30 }
  0xea   : > { %v711_v21 = vadd.f32 %v710_v41, %v622_v5  ;;  %v855_v25 = vadd.f32 %v854_v19, %v791_v16  ;;  %v806_v52 = vmul.f32 %v1524_v53, %v1524_v53  ;;  %v744_v35 = vadd.f32 %v743_v46, %v1545_v0 }
  0xeb   : > { %705 = vadd.xlane.f32.xlu0 %v704_v6  ;;  %v849_v17 = vadd.f32 %v848_v9, %v786_v1  ;;  %v734_v6 = vadd.f32 %v1528_v55, %v1526_v54  ;;  %v813_v9 = vmul.f32 %v1533_v57, %v1533_v57  ;;  %v814_v54 = vmul.f32 %v1535_v58, %v1535_v58 }
  0xec   : > { %v856_v36 = vadd.f32 %v855_v25, %v792_v32  ;;  %v872_v10 = vadd.f32 %v871_v38, %v806_v52 }
  0xed   : > { %850 = vadd.xlane.f32.xlu2 %v849_v17  ;;  %v879_v17 = vadd.f32 %v812_v51, %v811_v47  ;;  %v735_v18 = vadd.f32 %v734_v6, %v1533_v57 }
  0xee   : > { %v651_v24 = vpop.f32.mrf.mxu2 }
  0xef   : > { %v712_v26 = vadd.f32 %v711_v21, %v651_v24  ;;  %v680_v27 = vpop.f32.mrf.mxu3  ;;  %v596_v28 = vpop.f32.mrf.mxu0  ;;  %v793_v48 = vmul.f32 %v651_v24, %v651_v24  ;;  %v880_v23 = vadd.f32 %v879_v17, %v813_v9  ;;  %v736_v43 = vadd.f32 %v735_v18, %v1535_v58 }
  0xf0   : > { %v625_v31 = vpop.f32.mrf.mxu1  ;;  %v719_v33 = vadd.f32 %v718_v45, %v596_v28  ;;  %v799_v37 = vmul.f32 %v596_v28, %v596_v28  ;;  %v794_v62 = vmul.f32 %v680_v27, %v680_v27 }
  0xf1   : > { %v713_v34 = vadd.f32 %v712_v26, %v680_v27  ;;  %v857_v50 = vadd.f32 %v856_v36, %v793_v48  ;;  %v800_v1 = vmul.f32 %v625_v31, %v625_v31  ;;  %v881_v29 = vadd.f32 %v880_v23, %v814_v54 }
  0xf2   : > { %v720_v39 = vadd.f32 %v719_v33, %v625_v31  ;;  %v864_v63 = vadd.f32 %v863_v49, %v799_v37 }
  0xf3   : > { %714 = vadd.xlane.f32.xlu0 %v713_v34  ;;  %v858_v15 = vadd.f32 %v857_v50, %v794_v62  ;;  %v828_v50 = vmul.f32 %v1553_v4, %v1553_v4  ;;  %v752_v62 = vadd.f32 %v1553_v4, %v1551_v3  ;;  %v835_v4 = vmul.f32 %v1563_v12, %v1563_v12 }
  0xf4   : > { %v865_v19 = vadd.f32 %v864_v63, %v800_v1 }
  0xf5   : > { %v897_v6 = vadd.f32 %v828_v50, %v827_v59  ;;  %v753_v9 = vadd.f32 %v752_v62, %v1559_v8 }
  0xf6   : > { %v654_v60 = vpop.f32.mrf.mxu2 }
  0xf7   : > { %v721_v5 = vadd.f32 %v720_v39, %v654_v60  ;;  %v683_v40 = vpop.f32.mrf.mxu3  ;;  %v598_v41 = vpop.f32.mrf.mxu0  ;;  %v801_v14 = vmul.f32 %v654_v60, %v654_v60  ;;  %v745_v39 = vadd.f32 %v744_v35, %v1549_v2  ;;  %v829_v2 = vmul.f32 %v1559_v8, %v1559_v8 }
  0xf8   : > { %v807_v53 = vmul.f32 %v598_v41, %v598_v41  ;;  %v627_v42 = vpop.f32.mrf.mxu1  ;;  %v802_v55 = vmul.f32 %v683_v40, %v683_v40  ;;  %v728_v25 = vadd.f32 %v1531_v56, %v598_v41  ;;  %v754_v8 = vadd.f32 %v753_v9, %v1561_v11 }
  0xf9   : > { %v722_v16 = vadd.f32 %v721_v5, %v683_v40  ;;  %v808_v44 = vmul.f32 %v627_v42, %v627_v42  ;;  %v866_v24 = vadd.f32 %v865_v19, %v801_v14  ;;  %v830_v14 = vmul.f32 %v1561_v11, %v1561_v11 }
  0xfa   : > { %v873_v21 = vadd.f32 %v872_v10, %v807_v53  ;;  %v729_v36 = vadd.f32 %v728_v25, %v627_v42  ;;  %v898_v10 = vadd.f32 %v897_v6, %v829_v2 }
  0xfb   : > { %859 = vadd.xlane.f32.xlu0 %v858_v15  ;;  %723 = vadd.xlane.f32.xlu1 %v722_v16  ;;  %v867_v33 = vadd.f32 %v866_v24, %v802_v55  ;;  %v836_v15 = vmul.f32 %v1565_v13, %v1565_v13  ;;  %v761_v55 = vadd.f32 %v1565_v13, %v1563_v12 }
  0xfc   : > { %v874_v26 = vadd.f32 %v873_v21, %v808_v44  ;;  %v899_v54 = vadd.f32 %v898_v10, %v830_v14  ;;  %v837_v44 = vmul.f32 %v1567_v20, %v1567_v20 }
  0xfe   : > { %v656_v45 = vpop.f32.mrf.mxu2 }
  0xff   : > { %v809_v27 = vmul.f32 %v656_v45, %v656_v45  ;;  %v685_v28 = vpop.f32.mrf.mxu3  ;;  %v601_v57 = vpop.f32.mrf.mxu0  ;;  %v730_v49 = vadd.f32 %v729_v36, %v656_v45  ;;  %v906_v45 = vadd.f32 %v836_v15, %v835_v4 }
 0x100   : > { %v815_v30 = vmul.f32 %v601_v57, %v601_v57  ;;  %v630_v31 = vpop.f32.mrf.mxu1  ;;  %v810_v32 = vmul.f32 %v685_v28, %v685_v28  ;;  %v737_v48 = vadd.f32 %v736_v43, %v601_v57  ;;  %v762_v43 = vadd.f32 %v761_v55, %v1567_v20 }
 0x101   : > { %v875_v34 = vadd.f32 %v874_v26, %v809_v27  ;;  %v816_v37 = vmul.f32 %v630_v31, %v630_v31  ;;  %v731_v40 = vadd.f32 %v730_v49, %v685_v28  ;;  %v907_v11 = vadd.f32 %v906_v45, %v837_v44 }
 0x102   : > { %v882_v58 = vadd.f32 %v881_v29, %v815_v30  ;;  %v738_v38 = vadd.f32 %v737_v48, %v630_v31  ;;  %v838_v57 = vmul.f32 %v1569_v22, %v1569_v22  ;;  %v763_v46 = vadd.f32 %v762_v43, %v1569_v22 }
 0x103   : > { %868 = vadd.xlane.f32.xlu1 %v867_v33  ;;  %v876_v56 = vadd.f32 %v875_v34, %v810_v32 }
 0x104   : > { %v883_v52 = vadd.f32 %v882_v58, %v816_v37  ;;  %v908_v20 = vadd.f32 %v907_v11, %v838_v57 }
 0x105   : > { %877 = vadd.xlane.f32.xlu2 %v876_v56 }
 0x106   : > { %v659_v61 = vpop.f32.mrf.mxu2 }
 0x107   : > { %v739_v47 = vadd.f32 %v738_v38, %v659_v61  ;;  %v817_v0 = vmul.f32 %v659_v61, %v659_v61  ;;  %v688_v51 = vpop.f32.mrf.mxu3  ;;  %v603_v60 = vpop.f32.mrf.mxu0 }
 0x108   : > { %v818_v63 = vmul.f32 %v688_v51, %v688_v51  ;;  %v1617_v1 = vpop.f32.mrf.mxu1  ;;  %v746_v5 = vadd.f32 %v745_v39, %v603_v60  ;;  %v823_v37 = vmul.f32 %v603_v60, %v603_v60 }
 0x109   : > { %v884_v41 = vadd.f32 %v883_v52, %v817_v0  ;;  %v740_v42 = vadd.f32 %v739_v47, %v688_v51  ;;  %v824_v0 = vmul.f32 %v1617_v1, %v1617_v1 }
 0x10a   : > { %v747_v3 = vadd.f32 %v746_v5, %v1617_v1  ;;  %v891_v59 = vadd.f32 %v1557_v7, %v823_v37 }
 0x10b   : > { %732 = vadd.xlane.f32.xlu1 %v731_v40  ;;  %v885_v53 = vadd.f32 %v884_v41, %v818_v63 }
 0x10c   : > { %v892_v2 = vadd.f32 %v891_v59, %v824_v0 }
 0x10d   : > { %886 = vadd.xlane.f32.xlu0 %v885_v53  ;;  %741 = vadd.xlane.f32.xlu2 %v740_v42 }
 0x10e   : > { %v661_v16 = vpop.f32.mrf.mxu2 }
 0x10f   : > { %v748_v17 = vadd.f32 %v747_v3, %v661_v16  ;;  %v690_v18 = vpop.f32.mrf.mxu3  ;;  %v606_v19 = vpop.f32.mrf.mxu0  ;;  %v825_v51 = vmul.f32 %v661_v16, %v661_v16 }
 0x110   : > { %v831_v21 = vmul.f32 %v606_v19, %v606_v19  ;;  %v635_v23 = vpop.f32.mrf.mxu1  ;;  %v755_v24 = vadd.f32 %v754_v8, %v606_v19  ;;  %v826_v41 = vmul.f32 %v690_v18, %v690_v18 }
 0x111   : > { %v832_v26 = vmul.f32 %v635_v23, %v635_v23  ;;  %v749_v27 = vadd.f32 %v748_v17, %v690_v18  ;;  %v893_v40 = vadd.f32 %v892_v2, %v825_v51 }
 0x112   : > { %v900_v25 = vadd.f32 %v899_v54, %v831_v21  ;;  %v756_v28 = vadd.f32 %v755_v24, %v635_v23 }
 0x113   : > { %v894_v6 = vadd.f32 %v893_v40, %v826_v41 }
 0x114   : > { %v901_v12 = vadd.f32 %v900_v25, %v832_v26 }
 0x115   : > { %750 = vadd.xlane.f32.xlu2 %v749_v27 }
 0x116   : > { %v664_v29 = vpop.f32.mrf.mxu2 }
 0x117   : > { %v757_v13 = vadd.f32 %v756_v28, %v664_v29  ;;  %v833_v30 = vmul.f32 %v664_v29, %v664_v29  ;;  %v693_v31 = vpop.f32.mrf.mxu3  ;;  %v608_v32 = vpop.f32.mrf.mxu0 }
 0x118   : > { %v834_v48 = vmul.f32 %v693_v31, %v693_v31  ;;  %v839_v33 = vmul.f32 %v608_v32, %v608_v32  ;;  %v764_v34 = vadd.f32 %v763_v46, %v608_v32  ;;  %v637_v58 = vpop.f32.mrf.mxu1 }
 0x119   : > { %v758_v35 = vadd.f32 %v757_v13, %v693_v31  ;;  %v902_v36 = vadd.f32 %v901_v12, %v833_v30  ;;  %v840_v39 = vmul.f32 %v637_v58, %v637_v58 }
 0x11a   : > { %v909_v56 = vadd.f32 %v908_v20, %v839_v33  ;;  %v765_v38 = vadd.f32 %v764_v34, %v637_v58 }
 0x11b   : > { %759 = vadd.xlane.f32.xlu0 %v758_v35  ;;  %v903_v49 = vadd.f32 %v902_v36, %v834_v48 }
 0x11c   : > { %v910_v61 = vadd.f32 %v909_v56, %v840_v39 }
 0x11d   : > { %904 = vadd.xlane.f32.xlu2 %v903_v49 }
 0x11e   : > { %v666_v22 = vpop.f32.mrf.mxu2 }
 0x11f   : > { %v766_v50 = vadd.f32 %v765_v38, %v666_v22  ;;  %v841_v52 = vmul.f32 %v666_v22, %v666_v22  ;;  %v695_v47 = vpop.f32.mrf.mxu3 }
 0x120   : > { %v842_v63 = vmul.f32 %v695_v47, %v695_v47 }
 0x121   : > { %v911_v62 = vadd.f32 %v910_v61, %v841_v52  ;;  %v767_v60 = vadd.f32 %v766_v50, %v695_v47 }
 0x123   : > { %768 = vadd.xlane.f32.xlu1 %v767_v60  ;;  %v912_v5 = vadd.f32 %v911_v62, %v842_v63 }
 0x125   : > { %913 = vadd.xlane.f32.xlu0 %v912_v5 }
 0x12b   : > { %895 = vadd.xlane.f32.xlu1 %v894_v6 }
 0x15e   : > { %v706_v7 = vpop.xlane.xlu0 %705 }
 0x15f   : > { %771 = vst.msk [vmem:[%s222_s4] sm:$0xff] %vm770_vm1, %v706_v7 }
 0x160   : > { %v851_v1 = vpop.xlane.xlu2 %850 }
 0x161   : > { %915 = vst.msk [vmem:[%s1648_s7] sm:$0xff] %vm770_vm1, %v851_v1 }
 0x166   : > { %v715_v9 = vpop.xlane.xlu0 %714 }
 0x167   : > { %772 = vst.msk [vmem:[%s222_s4 + $0x8] sm:$0xff] %vm770_vm1, %v715_v9 }
 0x16e   : > { %v860_v53 = vpop.xlane.xlu0 %859  ;;  %v724_v42 = vpop.xlane.xlu1 %723 }
 0x16f   : > { %916 = vst.msk [vmem:[%s1648_s7 + $0x8] sm:$0xff] %vm770_vm1, %v860_v53 }
 0x170   : > { %773 = vst.msk [vmem:[%s222_s4 + $0x10] sm:$0xff] %vm770_vm1, %v724_v42 }
 0x176   : > { %v869_v10 = vpop.xlane.xlu1 %868 }
 0x177   : > { %917 = vst.msk [vmem:[%s1648_s7 + $0x10] sm:$0xff] %vm770_vm1, %v869_v10 }
 0x178   : > { %v878_v14 = vpop.xlane.xlu2 %877 }
 0x179   : > { %918 = vst.msk [vmem:[%s1648_s7 + $0x18] sm:$0xff] %vm770_vm1, %v878_v14 }
 0x17e   : > { %v733_v3 = vpop.xlane.xlu1 %732 }
 0x17f   : > { %774 = vst.msk [vmem:[%s222_s4 + $0x18] sm:$0xff] %vm770_vm1, %v733_v3 }
 0x180   : > { %v887_v4 = vpop.xlane.xlu0 %886  ;;  %v742_v15 = vpop.xlane.xlu2 %741 }
 0x181   : > { %919 = vst.msk [vmem:[%s1648_s7 + $0x20] sm:$0xff] %vm770_vm1, %v887_v4 }
 0x182   : > { %775 = vst.msk [vmem:[%s222_s4 + $0x20] sm:$0xff] %vm770_vm1, %v742_v15 }
 0x188   : > { %v751_v16 = vpop.xlane.xlu2 %750 }
 0x189   : > { %776 = vst.msk [vmem:[%s222_s4 + $0x28] sm:$0xff] %vm770_vm1, %v751_v16 }
 0x18e   : > { %v760_v8 = vpop.xlane.xlu0 %759 }
 0x18f   : > { %777 = vst.msk [vmem:[%s222_s4 + $0x30] sm:$0xff] %vm770_vm1, %v760_v8 }
 0x190   : > { %v905_v17 = vpop.xlane.xlu2 %904 }
 0x191   : > { %921 = vst.msk [vmem:[%s1648_s7 + $0x30] sm:$0xff] %vm770_vm1, %v905_v17 }
 0x196   : > { %v769_v18 = vpop.xlane.xlu1 %768 }
 0x197   : > { %778 = vst.msk [vmem:[%s222_s4 + $0x38] sm:$0xff] %vm770_vm1, %v769_v18 }
 0x198   : > { %v914_v19 = vpop.xlane.xlu0 %913 }
 0x199   : > { %922 = vst.msk [vmem:[%s1648_s7 + $0x38] sm:$0xff] %vm770_vm1, %v914_v19 }
 0x19e   : > { %v896_v21 = vpop.xlane.xlu1 %895 }
 0x19f   : > { %920 = vst.msk [vmem:[%s1648_s7 + $0x28] sm:$0xff] %vm770_vm1, %v896_v21 }
 0x1a0 PF: > { %s14_s14 = sadd.s32 1, %s1339_s14   ;;  %s1687_s12 = smov %s1335_s13 }
 0x1a1   : > { %p11_p5 = scmp.ge.s32.totalorder %s14_s14, 4   ;;  %s1688_s13 = smov %s1690_s15 }
 0x1a3   :  { %13 = sbr.rel (!%p11_p5) target bundleno = 2 (0x2), region = 70 }

// kernel: adapt_layer_off_forward.4
= control target key start
LH: loop header
LB: loop body
LE: loop exit
PB: predicated region body
PF: predicated region fallthrough
CT: control target
= control target key end

     0   :  { %s1402_s15 = smov 0   ;;  %s1404_s16 = smov 0   ;;  %s1773_s0 = inlined_call_operand.vmem [shape: bf16[2,64,1024], index: 0, kind: input, shape index: {}]   ;;  %s1774_s1 = inlined_call_operand.vmem [shape: bf16[64,64], index: 1, kind: input, shape index: {}]   ;;  %s1775_s2 = inlined_call_operand.vmem [shape: f32[64,1], index: 2, kind: input, shape index: {}]   ;;  %s1776_s3 = inlined_call_operand.vmem [shape: bf16[3,64], index: 3, kind: input, shape index: {}]   ;;  %s1777_s4 = inlined_call_operand.vmem [shape: f32[2,3,1024], index: 4, kind: output, shape index: {}]  }
   0x1   :  { %s1406_s17 = smov 0  }
   0x2 LB: > { %s26_s18 = sadd.s32 1, %s1370_s16  ;;  %p1079_p0 = scmp.ge.s32.totalorder %s1374_s17, 1  ;;  %s1374_s17 = sphi %s1406_s17, %s14_s17   ;;  %s1370_s16 = sphi %s1404_s16, %s1779_s16   ;;  %s1366_s15 = sphi %s1402_s15, %s1778_s15  }
   0x3   : > { %p28_p1 = scmp.ge.s32.totalorder %s26_s18, 2  ;;  %p183_p2 = scmp.lt.s32.totalorder %s1374_s17, 3 }
   0x5   : > { %s1781_s18 = smov (%p28_p1, %s26_s18), 0  ;;  %p184_p3 = pnand %p1079_p0, %p183_p2 }
   0x6   : > { %p218_p4 = scmp.lt.s32.totalorder (!%p184_p3), %s1366_s15, 1 }
   0x7   : > { %187 = sbr.rel (%p184_p3) target bundleno = 452 (0x1c4), region = 36 }
   0xc   : > { %v284_v0 = vld [vmem:[%s1775_s2 + $0x30] sm:$0xff]  ;;  %v282_v1 = vld [vmem:[%s1775_s2 + $0x20] sm:$0xff]  ;;  %v1376_v2 = vmov 0   ;;  %s1783_s15 = smov (!%p218_p4, %s1366_s15), 1  ;;  %v285_v6 = vld [vmem:[%s1775_s2 + $0x38] sm:$0xff]  ;;  %vm506_vm0 = vcmask 523264  }
   0xd   : > { %1333 = vset.pattern.permute.xlu0 %v1376_v2  ;;  %1334 = vset.pattern.permute.xlu1 %v1376_v2  ;;  %s1270_s23 = sshll.u32 %s1783_s15, 8  ;;  %v283_v11 = vld [vmem:[%s1775_s2 + $0x28] sm:$0xff]  ;;  %v1479_v56 = vld [vmem:[%s1774_s1] sm:$0xff]  ;;  %s1271_s27 = sshll.u32 %s1783_s15, 5  ;;  %vm975_vm1 = vcmask 1043456  }
   0xe   : > { %318 = vperm.xlu0 %1333, %v284_v0   ;;  %308 = vperm.xlu1 %1334, %v282_v1   ;;  %s1432_s26 = scalar_lea.vmem %s1773_s0, %s1270_s23  ;;  %v278_v62 = vld [vmem:[%s1775_s2] sm:$0xff]  ;;  %s235_s30 = scalar_lea.vmem %s1777_s4, %s1271_s27 }
   0xf   : > { %1335 = vset.pattern.permute.xlu2 %v1376_v2  ;;  %v1198_v3 = vld [vmem:[%s1432_s26 + $0xc0] sm:$0xf]  ;;  %v1300_v5 = vld [vmem:[%s1432_s26 + $0xc4] sm:$0xf]  ;;  %v1206_v9 = vld [vmem:[%s1432_s26 + $0xc8] sm:$0xf] }
  0x10   : > { %v1304_v4 = vld [vmem:[%s1432_s26 + $0xdc] sm:$0xf0]  ;;  %v1200_v8 = vld [vmem:[%s1432_s26 + $0xe0] sm:$0xf0]  ;;  %v1305_v10 = vld [vmem:[%s1432_s26 + $0xe4] sm:$0xf0] }
  0x11   : > { %v1199_v7 = vor.u32 %v1304_v4, %v1198_v3  ;;  %v1203_v12 = vor.u32 %v1300_v5, %v1200_v8  ;;  %v1207_v13 = vor.u32 %v1305_v10, %v1206_v9  ;;  %v1301_v14 = vld [vmem:[%s1432_s26 + $0xcc] sm:$0xf]  ;;  %v1166_v16 = vld [vmem:[%s1432_s26 + $0x80] sm:$0xf]  ;;  %v1292_v19 = vld [vmem:[%s1432_s26 + $0x84] sm:$0xf] }
  0x12   : > { %v1208_v15 = vld [vmem:[%s1432_s26 + $0xe8] sm:$0xf0]  ;;  %v1296_v18 = vld [vmem:[%s1432_s26 + $0x9c] sm:$0xf0]  ;;  %v1168_v20 = vld [vmem:[%s1432_s26 + $0xa0] sm:$0xf0] }
  0x13   : > { %523 = vmatpush.bf16.msra.mxu0 %v1199_v7  ;;  %v1211_v17 = vor.u32 %v1301_v14, %v1208_v15  ;;  %552 = vmatpush.bf16.msra.mxu1 %v1203_v12  ;;  %v1167_v21 = vor.u32 %v1296_v18, %v1166_v16  ;;  %v1171_v22 = vor.u32 %v1292_v19, %v1168_v20  ;;  %v1174_v23 = vld [vmem:[%s1432_s26 + $0x88] sm:$0xf]  ;;  %v1293_v25 = vld [vmem:[%s1432_s26 + $0x8c] sm:$0xf]  ;;  %v1134_v28 = vld [vmem:[%s1432_s26 + $0x40] sm:$0xf] }
  0x14   : > { %581 = vmatpush.bf16.msra.mxu2 %v1207_v13  ;;  %v1297_v24 = vld [vmem:[%s1432_s26 + $0xa4] sm:$0xf0]  ;;  %v1176_v27 = vld [vmem:[%s1432_s26 + $0xa8] sm:$0xf0]  ;;  %v1288_v29 = vld [vmem:[%s1432_s26 + $0x5c] sm:$0xf0] }
  0x15   : > { %610 = vmatpush.bf16.msra.mxu3 %v1211_v17  ;;  %v1175_v26 = vor.u32 %v1297_v24, %v1174_v23  ;;  %v1179_v30 = vor.u32 %v1293_v25, %v1176_v27  ;;  %v1284_v31 = vld [vmem:[%s1432_s26 + $0x44] sm:$0xf]  ;;  %v1142_v33 = vld [vmem:[%s1432_s26 + $0x48] sm:$0xf]  ;;  %v1135_v34 = vor.u32 %v1288_v29, %v1134_v28  ;;  %v1285_v36 = vld [vmem:[%s1432_s26 + $0x4c] sm:$0xf] }
  0x16   : > { %323 = vperm.xlu0 %1333, %v285_v6   ;;  %v1136_v32 = vld [vmem:[%s1432_s26 + $0x60] sm:$0xf0]  ;;  %313 = vperm.xlu1 %1334, %v283_v11   ;;  %v1289_v35 = vld [vmem:[%s1432_s26 + $0x64] sm:$0xf0]  ;;  %v1144_v37 = vld [vmem:[%s1432_s26 + $0x68] sm:$0xf0] }
  0x17   : > { %524 = vmatpush.bf16.msra.mxu0 %v1167_v21  ;;  %553 = vmatpush.bf16.msra.mxu1 %v1171_v22  ;;  %v1139_v38 = vor.u32 %v1284_v31, %v1136_v32  ;;  %v1143_v39 = vor.u32 %v1289_v35, %v1142_v33  ;;  %v1102_v40 = vld [vmem:[%s1432_s26] sm:$0xf]  ;;  %v1276_v42 = vld [vmem:[%s1432_s26 + $0x4] sm:$0xf]  ;;  %v1147_v43 = vor.u32 %v1285_v36, %v1144_v37  ;;  %v1110_v45 = vld [vmem:[%s1432_s26 + $0x8] sm:$0xf] }
  0x18   : > { %582 = vmatpush.bf16.msra.mxu2 %v1175_v26  ;;  %v1280_v41 = vld [vmem:[%s1432_s26 + $0x1c] sm:$0xf0]  ;;  %v1104_v44 = vld [vmem:[%s1432_s26 + $0x20] sm:$0xf0]  ;;  %v1281_v46 = vld [vmem:[%s1432_s26 + $0x24] sm:$0xf0] }
  0x19   : > { %611 = vmatpush.bf16.msra.mxu3 %v1179_v30  ;;  %v1277_v47 = vld [vmem:[%s1432_s26 + $0xc] sm:$0xf]  ;;  %v1303_v49 = vld [vmem:[%s1432_s26 + $0xdc] sm:$0xf]  ;;  %v1103_v50 = vor.u32 %v1280_v41, %v1102_v40  ;;  %v1222_v52 = vld [vmem:[%s1432_s26 + $0xd8] sm:$0xf]  ;;  %v1107_v54 = vor.u32 %v1276_v42, %v1104_v44  ;;  %v1111_v55 = vor.u32 %v1281_v46, %v1110_v45 }
  0x1a   : > { %v1112_v48 = vld [vmem:[%s1432_s26 + $0x28] sm:$0xf0]  ;;  %v1224_v51 = vld [vmem:[%s1432_s26 + $0xf8] sm:$0xf0]  ;;  %v1307_v53 = vld [vmem:[%s1432_s26 + $0xf4] sm:$0xf0] }
  0x1b   : > { %525 = vmatpush.bf16.msra.mxu0 %v1135_v34  ;;  %554 = vmatpush.bf16.msra.mxu1 %v1139_v38  ;;  %v1302_v57 = vld [vmem:[%s1432_s26 + $0xd4] sm:$0xf]  ;;  %v1115_v58 = vor.u32 %v1277_v47, %v1112_v48  ;;  %v1223_v59 = vor.u32 %v1307_v53, %v1222_v52  ;;  %v1214_v61 = vld [vmem:[%s1432_s26 + $0xd0] sm:$0xf]  ;;  %v1227_v63 = vor.u32 %v1303_v49, %v1224_v51  ;;  %v1190_v1 = vld [vmem:[%s1432_s26 + $0x98] sm:$0xf] }
  0x1c   : > { %583 = vmatpush.bf16.msra.mxu2 %v1143_v39  ;;  %v1216_v60 = vld [vmem:[%s1432_s26 + $0xf0] sm:$0xf0]  ;;  %v1306_v0 = vld [vmem:[%s1432_s26 + $0xec] sm:$0xf0]  ;;  %v1299_v2 = vld [vmem:[%s1432_s26 + $0xb4] sm:$0xf0] }
  0x1d   : > { %612 = vmatpush.bf16.msra.mxu3 %v1147_v43  ;;  %v1295_v3 = vld [vmem:[%s1432_s26 + $0x9c] sm:$0xf]  ;;  %v1219_v5 = vor.u32 %v1302_v57, %v1216_v60  ;;  %v1215_v6 = vor.u32 %v1306_v0, %v1214_v61  ;;  %v1191_v7 = vor.u32 %v1299_v2, %v1190_v1  ;;  %v1294_v8 = vld [vmem:[%s1432_s26 + $0x94] sm:$0xf]  ;;  %v1182_v11 = vld [vmem:[%s1432_s26 + $0x90] sm:$0xf] }
  0x1e   : > { %288 = vperm.xlu0 %1333, %v278_v62   ;;  %v1192_v4 = vld [vmem:[%s1432_s26 + $0xb8] sm:$0xf0]  ;;  %v1184_v9 = vld [vmem:[%s1432_s26 + $0xb0] sm:$0xf0]  ;;  %v1298_v12 = vld [vmem:[%s1432_s26 + $0xac] sm:$0xf0] }
  0x1f   : > { %526 = vmatpush.bf16.msra.mxu0 %v1103_v50  ;;  %555 = vmatpush.bf16.msra.mxu1 %v1107_v54  ;;  %v1195_v10 = vor.u32 %v1295_v3, %v1192_v4  ;;  %v279_v13 = vld [vmem:[%s1775_s2 + $0x8] sm:$0xff]  ;;  %v1187_v14 = vor.u32 %v1294_v8, %v1184_v9  ;;  %v1287_v15 = vld [vmem:[%s1432_s26 + $0x5c] sm:$0xf]  ;;  %v1158_v17 = vld [vmem:[%s1432_s26 + $0x58] sm:$0xf]  ;;  %v1183_v18 = vor.u32 %v1298_v12, %v1182_v11 }
  0x20   : > { %584 = vmatpush.bf16.msra.mxu2 %v1111_v55  ;;  %v1160_v16 = vld [vmem:[%s1432_s26 + $0x78] sm:$0xf0]  ;;  %v1291_v19 = vld [vmem:[%s1432_s26 + $0x74] sm:$0xf0]  ;;  %v1286_v20 = vld [vmem:[%s1432_s26 + $0x54] sm:$0xf]  ;;  %293 = vperm.xlu1 %1334, %v279_v13  }
  0x21   : > { %613 = vmatpush.bf16.msra.mxu3 %v1115_v58  ;;  %v1152_v21 = vld [vmem:[%s1432_s26 + $0x70] sm:$0xf0]  ;;  %v1163_v22 = vor.u32 %v1287_v15, %v1160_v16  ;;  %v1159_v23 = vor.u32 %v1291_v19, %v1158_v17  ;;  %v1150_v24 = vld [vmem:[%s1432_s26 + $0x50] sm:$0xf]  ;;  %v1273_v28 = vld [vmem:[%s1774_s1 + $0x8] sm:$0xff] }
  0x22   : > { %1228 = vmatmul.msk.bf16.vlgmr.msra.gmra.mxu0 %vm506_vm0, %v1479_v56  ;;  %1232 = vmatmul.msk.bf16.vlgmr.msra.gmra.mxu1 %vm506_vm0, %v1479_v56  ;;  %v1290_v25 = vld [vmem:[%s1432_s26 + $0x6c] sm:$0xf0]  ;;  %v1155_v26 = vor.u32 %v1286_v20, %v1152_v21  ;;  %v1279_v29 = vld [vmem:[%s1432_s26 + $0x1c] sm:$0xf]  ;;  %v1126_v31 = vld [vmem:[%s1432_s26 + $0x18] sm:$0xf] }
  0x23   : > { %1236 = vmatmul.msk.bf16.vlgmr.msra.gmra.mxu2 %vm506_vm0, %v1479_v56  ;;  %668 = vmatpush.bf16.msrb.mxu1 %v1219_v5  ;;  %v1151_v27 = vor.u32 %v1290_v25, %v1150_v24  ;;  %v1128_v30 = vld [vmem:[%s1432_s26 + $0x38] sm:$0xf0]  ;;  %v1283_v33 = vld [vmem:[%s1432_s26 + $0x34] sm:$0xf0]  ;;  %v280_v34 = vld [vmem:[%s1775_s2 + $0x10] sm:$0xff] }
  0x24   : > { %697 = vmatpush.bf16.msrb.mxu2 %v1223_v59  ;;  %1240 = vmatmul.msk.bf16.vlgmr.msra.gmra.mxu3 %vm506_vm0, %v1479_v56  ;;  %v1131_v32 = vor.u32 %v1279_v29, %v1128_v30  ;;  %v1118_v35 = vld [vmem:[%s1432_s26 + $0x10] sm:$0xf]  ;;  %v1127_v36 = vor.u32 %v1283_v33, %v1126_v31  ;;  %v1278_v38 = vld [vmem:[%s1432_s26 + $0x14] sm:$0xf]  ;;  %v281_v42 = vld [vmem:[%s1775_s2 + $0x18] sm:$0xff] }
  0x25   : > { %726 = vmatpush.bf16.msrb.mxu3 %v1227_v63  ;;  %639 = vmatpush.bf16.msrb.mxu0 %v1215_v6  ;;  %v1282_v37 = vld [vmem:[%s1432_s26 + $0x2c] sm:$0xf0]  ;;  %v1120_v39 = vld [vmem:[%s1432_s26 + $0x30] sm:$0xf0]  ;;  %v1275_v44 = vld [vmem:[%s1774_s1 + $0x18] sm:$0xff] }
  0x26   : > { %298 = vperm.xlu2 %1335, %v280_v34   ;;  %v1119_v40 = vor.u32 %v1282_v37, %v1118_v35  ;;  %v1123_v41 = vor.u32 %v1278_v38, %v1120_v39  ;;  %v1274_v43 = vld [vmem:[%s1774_s1 + $0x10] sm:$0xff] }
  0x27   : > { %669 = vmatpush.bf16.msrb.mxu1 %v1187_v14 }
  0x28   : > { %698 = vmatpush.bf16.msrb.mxu2 %v1191_v7 }
  0x29   : > { %727 = vmatpush.bf16.msrb.mxu3 %v1195_v10  ;;  %640 = vmatpush.bf16.msrb.mxu0 %v1183_v18 }
  0x2b   : > { %670 = vmatpush.bf16.msrb.mxu1 %v1155_v26 }
  0x2c   : > { %699 = vmatpush.bf16.msrb.mxu2 %v1159_v23 }
  0x2d   : > { %728 = vmatpush.bf16.msrb.mxu3 %v1163_v22  ;;  %641 = vmatpush.bf16.msrb.mxu0 %v1151_v27 }
  0x2e   : > { %303 = vperm.xlu2 %1335, %v281_v42  }
  0x2f   : > { %671 = vmatpush.bf16.msrb.mxu1 %v1123_v41 }
  0x30   : > { %700 = vmatpush.bf16.msrb.mxu2 %v1127_v36 }
  0x31   : > { %729 = vmatpush.bf16.msrb.mxu3 %v1131_v32  ;;  %642 = vmatpush.bf16.msrb.mxu0 %v1119_v40 }
  0x32   : > { %1229 = vmatmul.msk.bf16.gmra.mxu0 %vm506_vm0, %v1273_v28  ;;  %1233 = vmatmul.msk.bf16.gmra.mxu1 %vm506_vm0, %v1273_v28 }
  0x33   : > { %1237 = vmatmul.msk.bf16.gmra.mxu2 %vm506_vm0, %v1273_v28 }
  0x34   : > { %1241 = vmatmul.msk.bf16.gmra.mxu3 %vm506_vm0, %v1273_v28 }
  0x42   : > { %1230 = vmatmul.msk.bf16.gmra.mxu0 %vm506_vm0, %v1274_v43  ;;  %1234 = vmatmul.msk.bf16.gmra.mxu1 %vm506_vm0, %v1274_v43 }
  0x43   : > { %1238 = vmatmul.msk.bf16.gmra.mxu2 %vm506_vm0, %v1274_v43 }
  0x44   : > { %1242 = vmatmul.msk.bf16.gmra.mxu3 %vm506_vm0, %v1274_v43 }
  0x52   : > { %1231 = vmatmul.msk.bf16.gmra.mxu0 %vm506_vm0, %v1275_v44  ;;  %1235 = vmatmul.msk.bf16.gmra.mxu1 %vm506_vm0, %v1275_v44 }
  0x53   : > { %1239 = vmatmul.msk.bf16.gmra.mxu2 %vm506_vm0, %v1275_v44 }
  0x54   : > { %1243 = vmatmul.msk.bf16.gmra.mxu3 %vm506_vm0, %v1275_v44 }
  0x62   : > { %1244 = vmatmul.msk.bf16.vlgmr.msrb.gmra.mxu0 %vm506_vm0, %v1479_v56  ;;  %1248 = vmatmul.msk.bf16.vlgmr.msrb.gmra.mxu1 %vm506_vm0, %v1479_v56 }
  0x63   : > { %1252 = vmatmul.msk.bf16.vlgmr.msrb.gmra.mxu2 %vm506_vm0, %v1479_v56 }
  0x64   : > { %1256 = vmatmul.msk.bf16.vlgmr.msrb.gmra.mxu3 %vm506_vm0, %v1479_v56 }
  0x72   : > { %1245 = vmatmul.msk.bf16.gmra.mxu0 %vm506_vm0, %v1273_v28  ;;  %1249 = vmatmul.msk.bf16.gmra.mxu1 %vm506_vm0, %v1273_v28 }
  0x73   : > { %1253 = vmatmul.msk.bf16.gmra.mxu2 %vm506_vm0, %v1273_v28 }
  0x74   : > { %1257 = vmatmul.msk.bf16.gmra.mxu3 %vm506_vm0, %v1273_v28 }
  0x80   : > { %v1590_v63 = vpop.permute.xlu0 %318  ;;  %v1592_v0 = vpop.permute.xlu1 %308 }
  0x81   : > { %v1598_v6 = vpop.permute.xlu2 %298 }
  0x82   : > { %1246 = vmatmul.msk.bf16.gmra.mxu0 %vm506_vm0, %v1274_v43  ;;  %1250 = vmatmul.msk.bf16.gmra.mxu1 %vm506_vm0, %v1274_v43 }
  0x83   : > { %1254 = vmatmul.msk.bf16.gmra.mxu2 %vm506_vm0, %v1274_v43 }
  0x84   : > { %1258 = vmatmul.msk.bf16.gmra.mxu3 %vm506_vm0, %v1274_v43 }
  0x88   : > { %v1596_v5 = vpop.permute.xlu0 %323  ;;  %v1600_v11 = vpop.permute.xlu1 %313 }
  0x89   : > { %v1612_v24 = vpop.permute.xlu2 %303 }
  0x90   : > { %v1604_v14 = vpop.permute.xlu0 %288 }
  0x92   : > { %1247 = vmatmul.msk.bf16.gmra.mxu0 %vm506_vm0, %v1275_v44  ;;  %1251 = vmatmul.msk.bf16.gmra.mxu1 %vm506_vm0, %v1275_v44  ;;  %v1621_v32 = vpop.permute.xlu1 %293 }
  0x93   : > { %1255 = vmatmul.msk.bf16.gmra.mxu2 %vm506_vm0, %v1275_v44 }
  0x94   : > { %1259 = vmatmul.msk.bf16.gmra.mxu3 %vm506_vm0, %v1275_v44 }
  0x9f   : > { %v528_v45 = vpop.f32.mrf.mxu0  ;;  %v557_v46 = vpop.f32.mrf.mxu1 }
  0xa0   : > { %v1607_v18 = vadd.f32 %v528_v45, %v1604_v14  ;;  %v1619_v31 = vadd.f32 %v557_v46, %v1604_v14 }
  0xa2   : > { %v751_v36 = vmax.f32 %v1607_v18, 0.0 }
  0xa6   : > { %v1570_v47 = vpop.f32.mrf.mxu2 }
  0xa7   : > { %v1572_v48 = vpop.f32.mrf.mxu3  ;;  %v1574_v49 = vpop.f32.mrf.mxu0 }
  0xa8   : > { %v1576_v50 = vpop.f32.mrf.mxu1 }
  0xae   : > { %v1578_v51 = vpop.f32.mrf.mxu2 }
  0xaf   : > { %v1580_v52 = vpop.f32.mrf.mxu3  ;;  %v533_v53 = vpop.f32.mrf.mxu0 }
  0xb0   : > { %v562_v54 = vpop.f32.mrf.mxu1  ;;  %v534_v30 = vadd.f32 %v533_v53, %v1598_v6 }
  0xb1   : > { %v563_v35 = vadd.f32 %v562_v54, %v1598_v6  ;;  %v531_v54 = vadd.f32 %v1574_v49, %v1621_v32 }
  0xb2   : > { %v767_v53 = vmax.f32 %v534_v30, 0.0 }
  0xb6   : > { %v1582_v55 = vpop.f32.mrf.mxu2 }
  0xb7   : > { %v1584_v56 = vpop.f32.mrf.mxu3  ;;  %v535_v57 = vpop.f32.mrf.mxu0 }
  0xb8   : > { %v564_v58 = vpop.f32.mrf.mxu1  ;;  %v536_v34 = vadd.f32 %v535_v57, %v1612_v24  ;;  %v560_v57 = vadd.f32 %v1576_v50, %v1621_v32 }
  0xb9   : > { %v565_v40 = vadd.f32 %v564_v58, %v1612_v24 }
  0xbb   : > { %v776_v49 = vmax.f32 %v565_v40, 0.0  ;;  %v618_v40 = vadd.f32 %v1580_v52, %v1621_v32 }
  0xbe   : > { %v1586_v59 = vpop.f32.mrf.mxu2 }
  0xbf   : > { %v1588_v60 = vpop.f32.mrf.mxu3  ;;  %v538_v61 = vpop.f32.mrf.mxu0 }
  0xc0   : > { %v567_v62 = vpop.f32.mrf.mxu1  ;;  %v539_v19 = vadd.f32 %v538_v61, %v1592_v0 }
  0xc1   : > { %v568_v25 = vadd.f32 %v567_v62, %v1592_v0 }
  0xc2   : > { %v783_v37 = vmax.f32 %v539_v19, 0.0 }
  0xc3   : > { %v784_v41 = vmax.f32 %v568_v25, 0.0 }
  0xc6   : > { %v596_v1 = vpop.f32.mrf.mxu2 }
  0xc7   : > { %v1594_v2 = vpop.f32.mrf.mxu3  ;;  %v540_v3 = vpop.f32.mrf.mxu0  ;;  %v597_v50 = vadd.f32 %v596_v1, %v1592_v0  ;;  %v623_v1 = vadd.f32 %v1588_v60, %v1612_v24  ;;  %v589_v60 = vadd.f32 %v1578_v51, %v1621_v32  ;;  %v587_v51 = vadd.f32 %v1570_v47, %v1604_v14 }
  0xc8   : > { %v569_v4 = vpop.f32.mrf.mxu1  ;;  %v541_v20 = vadd.f32 %v540_v3, %v1600_v11  ;;  %v626_v19 = vadd.f32 %v1594_v2, %v1592_v0  ;;  %v592_v2 = vadd.f32 %v1582_v55, %v1598_v6 }
  0xc9   : > { %v570_v26 = vadd.f32 %v569_v4, %v1600_v11  ;;  %v775_v4 = vmax.f32 %v536_v34, 0.0  ;;  %v785_v30 = vmax.f32 %v597_v50, 0.0  ;;  %v761_v52 = vmax.f32 %v589_v60, 0.0  ;;  %v1682_v50 = vld [vmem:[%s1776_s3] sm:$0x3] }
  0xca   : > { %v791_v38 = vmax.f32 %v541_v20, 0.0  ;;  %v786_v34 = vmax.f32 %v626_v19, 0.0 }
  0xcb   : > { %v792_v42 = vmax.f32 %v570_v26, 0.0  ;;  %v759_v26 = vmax.f32 %v531_v54, 0.0 }
  0xce   : > { %v598_v7 = vpop.f32.mrf.mxu2 }
  0xcf   : > { %v627_v8 = vpop.f32.mrf.mxu3  ;;  %v543_v9 = vpop.f32.mrf.mxu0  ;;  %v599_v61 = vadd.f32 %v598_v7, %v1600_v11 }
  0xd0   : > { %v572_v10 = vpop.f32.mrf.mxu1  ;;  %v544_v12 = vadd.f32 %v543_v9, %v1590_v63  ;;  %v768_v9 = vmax.f32 %v563_v35, 0.0 }
  0xd1   : > { %v573_v13 = vadd.f32 %v572_v10, %v1590_v63  ;;  %v832_v10 = vpack.c.bf16 %v791_v38, %v783_v37 }
  0xd2   : > { %v799_v21 = vmax.f32 %v544_v12, 0.0  ;;  %v628_v12 = vadd.f32 %v627_v8, %v1600_v11  ;;  %v594_v8 = vadd.f32 %v1586_v59, %v1612_v24  ;;  %v621_v59 = vadd.f32 %v1584_v56, %v1598_v6 }
  0xd3   : > { %v800_v27 = vmax.f32 %v573_v13, 0.0 }
  0xd4   : > { %v777_v37 = vmax.f32 %v594_v8, 0.0 }
  0xd6   : > { %v601_v15 = vpop.f32.mrf.mxu2 }
  0xd7   : > { %v630_v16 = vpop.f32.mrf.mxu3  ;;  %v545_v17 = vpop.f32.mrf.mxu0  ;;  %v602_v43 = vadd.f32 %v601_v15, %v1590_v63 }
  0xd8   : > { %v546_v22 = vadd.f32 %v545_v17, %v1596_v5  ;;  %v574_v23 = vpop.f32.mrf.mxu1  ;;  %v631_v45 = vadd.f32 %v630_v16, %v1590_v63  ;;  %v833_v16 = vpack.c.bf16 %v792_v42, %v784_v41  ;;  %v778_v41 = vmax.f32 %v623_v1, 0.0 }
  0xd9   : > { %v575_v28 = vadd.f32 %v574_v23, %v1596_v5  ;;  %v801_v7 = vmax.f32 %v602_v43, 0.0  ;;  %v793_v23 = vmax.f32 %v599_v61, 0.0  ;;  %v816_v43 = vpack.c.bf16 %v759_v26, %v751_v36 }
  0xda   : > { %v807_v29 = vmax.f32 %v546_v22, 0.0  ;;  %v802_v20 = vmax.f32 %v631_v45, 0.0  ;;  %v752_v22 = vmax.f32 %v1619_v31, 0.0  ;;  %v760_v31 = vmax.f32 %v560_v57, 0.0 }
  0xdb   : > { %v808_v33 = vmax.f32 %v575_v28, 0.0  ;;  %v834_v38 = vpack.c.bf16 %v793_v23, %v785_v30  ;;  %v762_v57 = vmax.f32 %v618_v40, 0.0 }
  0xdc   : > { %v840_v39 = vpack.c.bf16 %v807_v29, %v799_v21  ;;  %v824_v29 = vpack.c.bf16 %v775_v4, %v767_v53  ;;  %v817_v45 = vpack.c.bf16 %v760_v31, %v752_v22  ;;  %v770_v53 = vmax.f32 %v621_v59, 0.0 }
  0xdd   : > { %v841_v44 = vpack.c.bf16 %v808_v33, %v800_v27  ;;  %v794_v27 = vmax.f32 %v628_v12, 0.0  ;;  %v825_v33 = vpack.c.bf16 %v776_v49, %v768_v9 }
  0xde   : > { %v603_v46 = vpop.f32.mrf.mxu2  ;;  %855 = vmatpush.bf16.msra.mxu0 %v840_v39  ;;  %v827_v61 = vpack.c.bf16 %v778_v41, %v770_v53 }
  0xdf   : > { %v604_v58 = vadd.f32 %v603_v46, %v1596_v5  ;;  %v632_v62 = vpop.f32.mrf.mxu3  ;;  %868 = vmatpush.bf16.msra.mxu1 %v841_v44  ;;  %v1635_v3 = vpop.f32.mrf.mxu0  ;;  %v835_v56 = vpack.c.bf16 %v794_v27, %v786_v34  ;;  %v769_v44 = vmax.f32 %v592_v2, 0.0  ;;  %v616_v46 = vadd.f32 %v1572_v48, %v1604_v14 }
  0xe0   : > { %v633_v13 = vadd.f32 %v632_v62, %v1596_v5  ;;  %v1639_v15 = vpop.f32.mrf.mxu1  ;;  %v1698_v27 = vadd.f32 %v1635_v3, %v1604_v14 }
  0xe1   : > { %v809_v17 = vmax.f32 %v604_v58, 0.0  ;;  %v826_v54 = vpack.c.bf16 %v777_v37, %v769_v44  ;;  %v753_v58 = vmax.f32 %v587_v51, 0.0  ;;  %v754_v18 = vmax.f32 %v616_v46, 0.0 }
  0xe2   : > { %v810_v21 = vmax.f32 %v633_v13, 0.0  ;;  %856 = vmatpush.bf16.msra.mxu0 %v832_v10  ;;  %v1707_v37 = vadd.f32 %v1639_v15, %v1604_v14  ;;  %v755_v41 = vmax.f32 %v1698_v27, 0.0 }
  0xe3   : > { %v842_v25 = vpack.c.bf16 %v809_v17, %v801_v7  ;;  %869 = vmatpush.bf16.msra.mxu1 %v833_v16  ;;  %v818_v47 = vpack.c.bf16 %v761_v52, %v753_v58  ;;  %v819_v9 = vpack.c.bf16 %v762_v57, %v754_v18 }
  0xe4   : > { %v843_v28 = vpack.c.bf16 %v810_v21, %v802_v20 }
  0xe5   : > { %881 = vmatpush.bf16.msra.mxu2 %v842_v25 }
  0xe6   : > { %894 = vmatpush.bf16.msra.mxu3 %v843_v28  ;;  %v1653_v35 = vpop.f32.mrf.mxu2  ;;  %857 = vmatpush.bf16.msra.mxu0 %v824_v29 }
  0xe7   : > { %v1657_v39 = vpop.f32.mrf.mxu3  ;;  %870 = vmatpush.bf16.msra.mxu1 %v825_v33  ;;  %v1659_v55 = vpop.f32.mrf.mxu0 }
  0xe8   : > { %v1663_v42 = vpop.f32.mrf.mxu1 }
  0xe9   : > { %882 = vmatpush.bf16.msra.mxu2 %v834_v38 }
  0xea   : > { %895 = vmatpush.bf16.msra.mxu3 %v835_v56  ;;  %858 = vmatpush.bf16.msra.mxu0 %v816_v43 }
  0xeb   : > { %871 = vmatpush.bf16.msra.mxu1 %v817_v45 }
  0xed   : > { %883 = vmatpush.bf16.msra.mxu2 %v826_v54  ;;  %1260 = vmatmul.msk.bf16.vlgmr.msra.gmra.mxu0 %vm506_vm0, %v1682_v50 }
  0xee   : > { %896 = vmatpush.bf16.msra.mxu3 %v827_v61  ;;  %v1671_v36 = vpop.f32.mrf.mxu2  ;;  %1261 = vmatmul.msk.bf16.vlgmr.msra.gmra.mxu1 %vm506_vm0, %v1682_v50 }
  0xef   : > { %v1673_v62 = vpop.f32.mrf.mxu3  ;;  %v649_v4 = vpop.f32.mrf.mxu0 }
  0xf0   : > { %v678_v48 = vpop.f32.mrf.mxu1  ;;  %v650_v56 = vadd.f32 %v649_v4, %v1598_v6  ;;  %v647_v4 = vadd.f32 %v1659_v55, %v1621_v32 }
  0xf1   : > { %884 = vmatpush.bf16.msra.mxu2 %v818_v47  ;;  %v679_v44 = vadd.f32 %v678_v48, %v1598_v6 }
  0xf2   : > { %897 = vmatpush.bf16.msra.mxu3 %v819_v9  ;;  %v676_v9 = vadd.f32 %v1663_v42, %v1621_v32  ;;  %v771_v48 = vmax.f32 %v650_v56, 0.0 }
  0xf4   : > { %1262 = vmatmul.msk.bf16.vlgmr.msra.gmra.mxu2 %vm506_vm0, %v1682_v50 }
  0xf5   : > { %1263 = vmatmul.msk.bf16.vlgmr.msra.gmra.mxu3 %vm506_vm0, %v1682_v50 }
  0xf6   : > { %v1675_v10 = vpop.f32.mrf.mxu2 }
  0xf7   : > { %v1677_v12 = vpop.f32.mrf.mxu3  ;;  %v651_v13 = vpop.f32.mrf.mxu0 }
  0xf8   : > { %v680_v49 = vpop.f32.mrf.mxu1  ;;  %v652_v45 = vadd.f32 %v651_v13, %v1612_v24  ;;  %v737_v56 = vadd.f32 %v1677_v12, %v1598_v6 }
  0xf9   : > { %v681_v15 = vadd.f32 %v680_v49, %v1612_v24  ;;  %v772_v49 = vmax.f32 %v679_v44, 0.0 }
  0xfe   : > { %v1688_v16 = vpop.f32.mrf.mxu2 }
  0xff   : > { %v1694_v7 = vpop.f32.mrf.mxu3  ;;  %v654_v17 = vpop.f32.mrf.mxu0 }
 0x100   : > { %v683_v19 = vpop.f32.mrf.mxu1  ;;  %v655_v31 = vadd.f32 %v654_v17, %v1592_v0 }
 0x101   : > { %v684_v3 = vadd.f32 %v683_v19, %v1592_v0  ;;  %v779_v19 = vmax.f32 %v652_v45, 0.0 }
 0x102   : > { %v787_v52 = vmax.f32 %v655_v31, 0.0 }
 0x103   : > { %v788_v61 = vmax.f32 %v684_v3, 0.0 }
 0x106   : > { %v712_v20 = vpop.f32.mrf.mxu2 }
 0x107   : > { %v741_v21 = vpop.f32.mrf.mxu3  ;;  %v656_v22 = vpop.f32.mrf.mxu0  ;;  %v713_v42 = vadd.f32 %v712_v20, %v1592_v0  ;;  %v739_v20 = vadd.f32 %v1694_v7, %v1612_v24 }
 0x108   : > { %v685_v8 = vpop.f32.mrf.mxu1  ;;  %v657_v59 = vadd.f32 %v656_v22, %v1600_v11  ;;  %v742_v31 = vadd.f32 %v741_v21, %v1592_v0  ;;  %v708_v0 = vadd.f32 %v1675_v10, %v1598_v6  ;;  %v734_v10 = vadd.f32 %v1673_v62, %v1621_v32 }
 0x109   : > { %v686_v38 = vadd.f32 %v685_v8, %v1600_v11  ;;  %v782_v44 = vmax.f32 %v739_v20, 0.0  ;;  %v703_v6 = vadd.f32 %v1653_v35, %v1604_v14 }
 0x10a   : > { %v795_v54 = vmax.f32 %v657_v59, 0.0 }
 0x10b   : > { %v796_v58 = vmax.f32 %v686_v38, 0.0 }
 0x10e   : > { %v714_v23 = vpop.f32.mrf.mxu2 }
 0x10f   : > { %v743_v25 = vpop.f32.mrf.mxu3  ;;  %v659_v26 = vpop.f32.mrf.mxu0  ;;  %v715_v22 = vadd.f32 %v714_v23, %v1600_v11 }
 0x110   : > { %v688_v1 = vpop.f32.mrf.mxu1  ;;  %v660_v28 = vadd.f32 %v659_v26, %v1590_v63  ;;  %v744_v55 = vadd.f32 %v743_v25, %v1600_v11 }
 0x111   : > { %v689_v2 = vadd.f32 %v688_v1, %v1590_v63  ;;  %v780_v1 = vmax.f32 %v681_v15, 0.0  ;;  %v797_v3 = vmax.f32 %v715_v22, 0.0 }
 0x112   : > { %v803_v43 = vmax.f32 %v660_v28, 0.0  ;;  %v836_v28 = vpack.c.bf16 %v795_v54, %v787_v52  ;;  %v798_v25 = vmax.f32 %v744_v55, 0.0 }
 0x113   : > { %v804_v46 = vmax.f32 %v689_v2, 0.0  ;;  %v837_v2 = vpack.c.bf16 %v796_v58, %v788_v61  ;;  %v829_v21 = vpack.c.bf16 %v780_v1, %v772_v49 }
 0x116   : > { %v717_v29 = vpop.f32.mrf.mxu2 }
 0x117   : > { %v746_v30 = vpop.f32.mrf.mxu3  ;;  %v661_v33 = vpop.f32.mrf.mxu0  ;;  %v718_v18 = vadd.f32 %v717_v29, %v1590_v63 }
 0x118   : > { %v662_v34 = vadd.f32 %v661_v33, %v1596_v5  ;;  %v690_v60 = vpop.f32.mrf.mxu1  ;;  %v747_v13 = vadd.f32 %v746_v30, %v1590_v63  ;;  %v756_v33 = vmax.f32 %v1707_v37, 0.0  ;;  %v789_v37 = vmax.f32 %v713_v42, 0.0 }
 0x119   : > { %v691_v40 = vadd.f32 %v690_v60, %v1596_v5  ;;  %v805_v63 = vmax.f32 %v718_v18, 0.0  ;;  %v710_v60 = vadd.f32 %v1688_v16, %v1612_v24  ;;  %v790_v16 = vmax.f32 %v742_v31, 0.0 }
 0x11a   : > { %v811_v51 = vmax.f32 %v662_v34, 0.0  ;;  %v806_v23 = vmax.f32 %v747_v13, 0.0  ;;  %v763_v34 = vmax.f32 %v647_v4, 0.0  ;;  %v838_v24 = vpack.c.bf16 %v797_v3, %v789_v37 }
 0x11b   : > { %v812_v53 = vmax.f32 %v691_v40, 0.0  ;;  %v764_v40 = vmax.f32 %v676_v9, 0.0  ;;  %v839_v45 = vpack.c.bf16 %v798_v25, %v790_v16 }
 0x11c   : > { %v844_v57 = vpack.c.bf16 %v811_v51, %v803_v43  ;;  %v705_v43 = vadd.f32 %v1671_v36, %v1621_v32  ;;  %v781_v51 = vmax.f32 %v710_v60, 0.0  ;;  %v820_v7 = vpack.c.bf16 %v763_v34, %v755_v41 }
 0x11d   : > { %v845_v47 = vpack.c.bf16 %v812_v53, %v804_v46  ;;  %v821_v12 = vpack.c.bf16 %v764_v40, %v756_v33  ;;  %v773_v46 = vmax.f32 %v708_v0, 0.0  ;;  %v732_v36 = vadd.f32 %v1657_v39, %v1604_v14 }
 0x11e   : > { %v719_v17 = vpop.f32.mrf.mxu2  ;;  %907 = vmatpush.bf16.msrb.mxu0 %v844_v57  ;;  %v774_v53 = vmax.f32 %v737_v56, 0.0  ;;  %v765_v15 = vmax.f32 %v705_v43, 0.0  ;;  %v766_v41 = vmax.f32 %v734_v10, 0.0  ;;  %v757_v32 = vmax.f32 %v703_v6, 0.0 }
 0x11f   : > { %v720_v8 = vadd.f32 %v719_v17, %v1596_v5  ;;  %v748_v26 = vpop.f32.mrf.mxu3  ;;  %920 = vmatpush.bf16.msrb.mxu1 %v845_v47  ;;  %v830_v27 = vpack.c.bf16 %v781_v51, %v773_v46  ;;  %v758_v35 = vmax.f32 %v732_v36, 0.0 }
 0x120   : > { %v749_v29 = vadd.f32 %v748_v26, %v1596_v5  ;;  %v828_v5 = vpack.c.bf16 %v779_v19, %v771_v48  ;;  %v831_v52 = vpack.c.bf16 %v782_v44, %v774_v53  ;;  %v822_v62 = vpack.c.bf16 %v765_v15, %v757_v32 }
 0x121   : > { %v813_v30 = vmax.f32 %v720_v8, 0.0  ;;  %v823_v14 = vpack.c.bf16 %v766_v41, %v758_v35 }
 0x122   : > { %v814_v59 = vmax.f32 %v749_v29, 0.0  ;;  %908 = vmatpush.bf16.msrb.mxu0 %v836_v28 }
 0x123   : > { %v846_v11 = vpack.c.bf16 %v813_v30, %v805_v63  ;;  %921 = vmatpush.bf16.msrb.mxu1 %v837_v2 }
 0x124   : > { %v847_v38 = vpack.c.bf16 %v814_v59, %v806_v23 }
 0x125   : > { %933 = vmatpush.bf16.msrb.mxu2 %v846_v11 }
 0x126   : > { %946 = vmatpush.bf16.msrb.mxu3 %v847_v38  ;;  %909 = vmatpush.bf16.msrb.mxu0 %v828_v5 }
 0x127   : > { %922 = vmatpush.bf16.msrb.mxu1 %v829_v21 }
 0x129   : > { %934 = vmatpush.bf16.msrb.mxu2 %v838_v24 }
 0x12a   : > { %947 = vmatpush.bf16.msrb.mxu3 %v839_v45  ;;  %910 = vmatpush.bf16.msrb.mxu0 %v820_v7 }
 0x12b   : > { %923 = vmatpush.bf16.msrb.mxu1 %v821_v12 }
 0x12d   : > { %935 = vmatpush.bf16.msrb.mxu2 %v830_v27  ;;  %1264 = vmatmul.msk.bf16.vlgmr.msrb.gmra.mxu0 %vm506_vm0, %v1682_v50 }
 0x12e   : > { %948 = vmatpush.bf16.msrb.mxu3 %v831_v52  ;;  %1265 = vmatmul.msk.bf16.vlgmr.msrb.gmra.mxu1 %vm506_vm0, %v1682_v50 }
 0x131   : > { %936 = vmatpush.bf16.msrb.mxu2 %v822_v62 }
 0x132   : > { %949 = vmatpush.bf16.msrb.mxu3 %v823_v14 }
 0x134   : > { %1266 = vmatmul.msk.bf16.vlgmr.msrb.gmra.mxu2 %vm506_vm0, %v1682_v50 }
 0x135   : > { %1267 = vmatmul.msk.bf16.vlgmr.msrb.gmra.mxu3 %vm506_vm0, %v1682_v50 }
 0x16a   : > { %v860_v54 = vpop.f32.mrf.mxu0 }
 0x16b   : > { %v873_v39 = vpop.f32.mrf.mxu1 }
 0x16c   : > { %1336 = vtanh.f32 %v873_v39 }
 0x172   : > { %v862_v18 = vpop.f32.mrf.mxu0  ;;  %v1337_v9 = vpop.eup %1336 }
 0x173   : > { %v875_v58 = vpop.f32.mrf.mxu1  ;;  %v971_v17 = vrot.slane %v1337_v9, 4 }
 0x177   : > { %v886_v61 = vpop.f32.mrf.mxu2 }
 0x178   : > { %v899_v57 = vpop.f32.mrf.mxu3 }
 0x179   : > { %1338 = vtanh.f32 %v899_v57 }
 0x17a   : > { %1340 = vtanh.f32 %v860_v54 }
 0x17b   : > { %1342 = vtanh.f32 %v886_v61 }
 0x17f   : > { %v888_v4 = vpop.f32.mrf.mxu2  ;;  %v1339_v48 = vpop.eup %1338 }
 0x180   : > { %v901_v47 = vpop.f32.mrf.mxu3  ;;  %v1341_v13 = vpop.eup %1340  ;;  %v972_v49 = vrot.slane %v1339_v48, 4 }
 0x181   : > { %v1343_v19 = vpop.eup %1342  ;;  %v976_v50 = vsel %vm975_vm1, %v1341_v13, %v971_v17 }
 0x182   : > { %v977_v22 = vsel %vm975_vm1, %v1343_v19, %v972_v49  ;;  %984 = vst [vmem:[%s235_s30] sm:$0x77] %v976_v50 }
 0x183   : > { %985 = vst [vmem:[%s235_s30 + $0x8] sm:$0x77] %v977_v22 }
 0x1aa   : > { %v912_v8 = vpop.f32.mrf.mxu0 }
 0x1ab   : > { %v925_v26 = vpop.f32.mrf.mxu1  ;;  %1344 = vtanh.f32 %v912_v8 }
 0x1ac   : > { %1346 = vtanh.f32 %v925_v26 }
 0x1b1   : > { %v1345_v1 = vpop.eup %1344 }
 0x1b2   : > { %v1347_v28 = vpop.eup %1346  ;;  %v914_v55 = vpop.f32.mrf.mxu0 }
 0x1b3   : > { %v973_v29 = vrot.slane %v1347_v28, 4  ;;  %v927_v42 = vpop.f32.mrf.mxu1 }
 0x1b5   : > { %v978_v2 = vsel %vm975_vm1, %v1345_v1, %v973_v29 }
 0x1b6   : > { %986 = vst [vmem:[%s235_s30 + $0x10] sm:$0x77] %v978_v2 }
 0x1b7   : > { %v938_v63 = vpop.f32.mrf.mxu2 }
 0x1b8   : > { %1348 = vtanh.f32 %v938_v63  ;;  %v951_v30 = vpop.f32.mrf.mxu3 }
 0x1b9   : > { %1350 = vtanh.f32 %v951_v30 }
 0x1be   : > { %v1349_v33 = vpop.eup %1348 }
 0x1bf   : > { %v1351_v31 = vpop.eup %1350  ;;  %v940_v23 = vpop.f32.mrf.mxu2 }
 0x1c0   : > { %v974_v59 = vrot.slane %v1351_v31, 4  ;;  %v953_v34 = vpop.f32.mrf.mxu3 }
 0x1c2   : > { %v979_v60 = vsel %vm975_vm1, %v1349_v33, %v974_v59 }
 0x1c3   : > { %987 = vst [vmem:[%s235_s30 + $0x18] sm:$0x77] %v979_v60 }
 0x1c4 PF: > { %s14_s17 = sadd.s32 1, %s1374_s17   ;;  %s1778_s15 = smov %s1370_s16 }
 0x1c5   : > { %p11_p5 = scmp.ge.s32.totalorder %s14_s17, 4   ;;  %s1779_s16 = smov %s1781_s18 }
 0x1c7   :  { %13 = sbr.rel (!%p11_p5) target bundleno = 2 (0x2), region = 66 }

// kernel: adapt_layer_off_forward.5
= control target key start
LH: loop header
LB: loop body
LE: loop exit
PB: predicated region body
PF: predicated region fallthrough
CT: control target
= control target key end

     0   :  { %vm78_vm0 = vcmask 523264   ;;  %vm120_vm1 = vcmask 261120   ;;  %v537_v40 = vmov 0   ;;  %s823_s0 = inlined_call_operand.vmem [shape: bf16[64,32], index: 0, kind: input, shape index: {}]   ;;  %s824_s1 = inlined_call_operand.vmem [shape: bf16[64,64], index: 1, kind: input, shape index: {}]   ;;  %s825_s2 = inlined_call_operand.vmem [shape: f32[64,1], index: 2, kind: input, shape index: {}]   ;;  %s826_s3 = inlined_call_operand.vmem [shape: f32[64,1], index: 3, kind: input, shape index: {}]   ;;  %s827_s4 = inlined_call_operand.vmem [shape: f32[64,32], index: 4, kind: output, shape index: {}]  }
   0x1   :  { %v504_v0 = vld [vmem:[%s823_s0 + $0x18] sm:$0xff]  ;;  %v503_v1 = vld [vmem:[%s823_s0 + $0x10] sm:$0xff]  ;;  %v502_v2 = vld [vmem:[%s823_s0 + $0x8] sm:$0xff]  ;;  %518 = vset.pattern.permute.xlu1 %v537_v40  ;;  %519 = vset.pattern.permute.xlu0 %v537_v40 }
   0x2   :  { %95 = vmatpush.bf16.msra.mxu0 %v504_v0  ;;  %505 = vmatpush.bf16.msra.mxu1 %v504_v0  ;;  %v501_v3 = vld [vmem:[%s823_s0] sm:$0xff]  ;;  %v498_v5 = vld [vmem:[%s824_s1 + $0x8] sm:$0xff]  ;;  %v500_v6 = vld [vmem:[%s824_s1 + $0x18] sm:$0xff] }
   0x3   :  { %507 = vmatpush.bf16.msra.mxu3 %v504_v0  ;;  %506 = vmatpush.bf16.msra.mxu2 %v504_v0  ;;  %v497_v4 = vld [vmem:[%s824_s1] sm:$0xff]  ;;  %v499_v7 = vld [vmem:[%s824_s1 + $0x10] sm:$0xff] }
   0x4   :  { %520 = vset.pattern.permute.xlu2 %v537_v40 }
   0x6   :  { %96 = vmatpush.bf16.msra.mxu0 %v503_v1  ;;  %508 = vmatpush.bf16.msra.mxu1 %v503_v1 }
   0x7   :  { %510 = vmatpush.bf16.msra.mxu3 %v503_v1  ;;  %509 = vmatpush.bf16.msra.mxu2 %v503_v1 }
   0xa   :  { %97 = vmatpush.bf16.msra.mxu0 %v502_v2  ;;  %511 = vmatpush.bf16.msra.mxu1 %v502_v2 }
   0xb   :  { %513 = vmatpush.bf16.msra.mxu3 %v502_v2  ;;  %512 = vmatpush.bf16.msra.mxu2 %v502_v2 }
   0xe   :  { %98 = vmatpush.bf16.msra.mxu0 %v501_v3  ;;  %514 = vmatpush.bf16.msra.mxu1 %v501_v3 }
   0xf   :  { %516 = vmatpush.bf16.msra.mxu3 %v501_v3  ;;  %515 = vmatpush.bf16.msra.mxu2 %v501_v3 }
  0x11   :  { %493 = vmatmul.msk.bf16.vlgmr.msra.gmra.mxu0 %vm78_vm0, %v497_v4  ;;  %494 = vmatmul.msk.bf16.vlgmr.msra.gmra.mxu1 %vm78_vm0, %v498_v5 }
  0x12   :  { %496 = vmatmul.msk.bf16.vlgmr.msra.gmra.mxu3 %vm78_vm0, %v500_v6  ;;  %495 = vmatmul.msk.bf16.vlgmr.msra.gmra.mxu2 %vm78_vm0, %v499_v7 }
  0x8e   :  { %v587_v8 = vpop.f32.mrf.mxu0  ;;  %v589_v9 = vpop.f32.mrf.mxu1 }
  0x8f   :  { %v127_v10 = vsel %vm120_vm1, %v589_v9, 0.0  ;;  %v121_v11 = vsel %vm120_vm1, %v587_v8, 0.0  ;;  %v153_v12 = vmul.f32 %v587_v8, %v587_v8  ;;  %v155_v14 = vmul.f32 %v589_v9, %v589_v9 }
  0x90   :  { %128 = vadd.xlane.f32.xlu1 %v127_v10  ;;  %122 = vadd.xlane.f32.xlu0 %v121_v11 }
  0x91   :  { %v161_v13 = vsel %vm120_vm1, %v153_v12, 0.0  ;;  %v167_v17 = vsel %vm120_vm1, %v155_v14, 0.0 }
  0x92   :  { %162 = vadd.xlane.f32.xlu2 %v161_v13 }
  0x95   :  { %v600_v15 = vpop.f32.mrf.mxu3  ;;  %v602_v16 = vpop.f32.mrf.mxu2 }
  0x96   :  { %v139_v18 = vsel %vm120_vm1, %v600_v15, 0.0  ;;  %v133_v19 = vsel %vm120_vm1, %v602_v16, 0.0  ;;  %v609_v20 = vpop.f32.mrf.mxu1  ;;  %v611_v21 = vpop.f32.mrf.mxu0  ;;  %v159_v23 = vmul.f32 %v600_v15, %v600_v15  ;;  %v157_v26 = vmul.f32 %v602_v16, %v602_v16 }
  0x97   :  { %v130_v22 = vsel %vm120_vm1, %v609_v20, 0.0  ;;  %v124_v24 = vsel %vm120_vm1, %v611_v21, 0.0  ;;  %v156_v28 = vmul.f32 %v609_v20, %v609_v20  ;;  %v154_v33 = vmul.f32 %v611_v21, %v611_v21 }
  0x98   :  { %168 = vadd.xlane.f32.xlu1 %v167_v17  ;;  %140 = vadd.xlane.f32.xlu0 %v139_v18  ;;  %v179_v25 = vsel %vm120_vm1, %v159_v23, 0.0  ;;  %v173_v30 = vsel %vm120_vm1, %v157_v26, 0.0 }
  0x99   :  { %v170_v32 = vsel %vm120_vm1, %v156_v28, 0.0  ;;  %v164_v36 = vsel %vm120_vm1, %v154_v33, 0.0 }
  0x9a   :  { %134 = vadd.xlane.f32.xlu2 %v133_v19 }
  0x9d   :  { %v622_v27 = vpop.f32.mrf.mxu3  ;;  %v629_v31 = vpop.f32.mrf.mxu2 }
  0x9e   :  { %v142_v29 = vsel %vm120_vm1, %v622_v27, 0.0  ;;  %v158_v34 = vmul.f32 %v629_v31, %v629_v31  ;;  %v136_v37 = vsel %vm120_vm1, %v629_v31, 0.0  ;;  %v160_v38 = vmul.f32 %v622_v27, %v622_v27 }
  0xa0   :  { %131 = vadd.xlane.f32.xlu1 %v130_v22  ;;  %125 = vadd.xlane.f32.xlu0 %v124_v24  ;;  %v176_v35 = vsel %vm120_vm1, %v158_v34, 0.0  ;;  %v182_v39 = vsel %vm120_vm1, %v160_v38, 0.0 }
  0xa2   :  { %180 = vadd.xlane.f32.xlu2 %v179_v25  ;;  %v217_v25 = vld [vmem:[%s825_s2] sm:$0xff] }
  0xa8   :  { %143 = vadd.xlane.f32.xlu1 %v142_v29  ;;  %174 = vadd.xlane.f32.xlu0 %v173_v30 }
  0xaa   :  { %171 = vadd.xlane.f32.xlu2 %v170_v32 }
  0xb0   :  { %177 = vadd.xlane.f32.xlu1 %v176_v35  ;;  %165 = vadd.xlane.f32.xlu0 %v164_v36 }
  0xb2   :  { %137 = vadd.xlane.f32.xlu2 %v136_v37 }
  0xb8   :  { %183 = vadd.xlane.f32.xlu0 %v182_v39 }
 0x103   :  { %v129_v41 = vpop.xlane.xlu1 %128  ;;  %v123_v42 = vpop.xlane.xlu0 %122 }
 0x104   :  { %v643_v43 = vmul.f32 0.03125, %v123_v42  ;;  %v645_v45 = vmul.f32 0.03125, %v129_v41  ;;  %v219_v42 = vld [vmem:[%s825_s2 + $0x10] sm:$0xff] }
 0x105   :  { %v163_v44 = vpop.xlane.xlu2 %162 }
 0x106   :  { %v193_v46 = vmul.f32 %v643_v43, %v643_v43  ;;  %v185_v47 = vmul.f32 0.03125, %v163_v44  ;;  %v195_v49 = vmul.f32 %v645_v45, %v645_v45 }
 0x108   :  { %v201_v48 = vsub.f32 %v185_v47, %v193_v46 }
 0x10a   :  { %v209_v50 = vmax.f32 %v201_v48, 0.0 }
 0x10b   :  { %v169_v51 = vpop.xlane.xlu1 %168  ;;  %v141_v52 = vpop.xlane.xlu0 %140 }
 0x10c   :  { %v225_v53 = vadd.f32 1e-05, %v209_v50  ;;  %v187_v54 = vmul.f32 0.03125, %v169_v51  ;;  %v651_v59 = vmul.f32 0.03125, %v141_v52 }
 0x10d   :  { %v135_v55 = vpop.xlane.xlu2 %134 }
 0x10e   :  { %521 = vrsqrt.f32 %v225_v53  ;;  %v203_v56 = vsub.f32 %v187_v54, %v195_v49  ;;  %v199_v1 = vmul.f32 %v651_v59, %v651_v59  ;;  %v655_v4 = vmul.f32 0.03125, %v135_v55  ;;  %v321_v54 = vld [vmem:[%s826_s3] sm:$0xff] }
 0x10f   :  { %vm239_vm3 = vweird.f32 %v225_v53 }
 0x110   :  { %v211_v57 = vmax.f32 %v203_v56, 0.0  ;;  %v197_v18 = vmul.f32 %v655_v4, %v655_v4 }
 0x112   :  { %v227_v58 = vadd.f32 1e-05, %v211_v57 }
 0x113   :  { %v132_v60 = vpop.xlane.xlu1 %131  ;;  %v126_v61 = vpop.xlane.xlu0 %125 }
 0x114   :  { %v522_v62 = vpop.eup %521  ;;  %523 = vrsqrt.f32 %v227_v58  ;;  %v657_v13 = vmul.f32 0.03125, %v132_v60  ;;  %v669_v34 = vmul.f32 0.03125, %v126_v61  ;;  %vm259_vm5 = vweird.f32 %v227_v58 }
 0x115   :  { %v234_v63 = vmul.f32 %v522_v62, %v225_v53  ;;  %v181_v0 = vpop.xlane.xlu2 %180  ;;  %vm240_vm2 = vweird.f32 %v522_v62 }
 0x116   :  { %v191_v2 = vmul.f32 0.03125, %v181_v0  ;;  %vm241_vm4 = vmor %vm239_vm3, %vm240_vm2  ;;  %v196_v30 = vmul.f32 %v657_v13, %v657_v13  ;;  %v194_v47 = vmul.f32 %v669_v34, %v669_v34 }
 0x117   :  { %v235_v3 = vmul.f32 %v522_v62, %v234_v63 }
 0x118   :  { %v207_v5 = vsub.f32 %v191_v2, %v199_v1 }
 0x119   :  { %v236_v6 = vmul.f32 0.5, %v235_v3 }
 0x11a   :  { %v524_v7 = vpop.eup %523  ;;  %v215_v10 = vmax.f32 %v207_v5, 0.0 }
 0x11b   :  { %v237_v11 = vsub.f32 1.5, %v236_v6  ;;  %v254_v12 = vmul.f32 %v524_v7, %v227_v58  ;;  %v144_v14 = vpop.xlane.xlu1 %143  ;;  %v175_v17 = vpop.xlane.xlu0 %174  ;;  %vm260_vm6 = vweird.f32 %v524_v7  ;;  %v323_v58 = vld [vmem:[%s826_s3 + $0x10] sm:$0xff] }
 0x11c   :  { %v661_v19 = vadd.f32 1e-05, %v215_v10  ;;  %v189_v22 = vmul.f32 0.03125, %v175_v17  ;;  %vm261_vm7 = vmor %vm259_vm5, %vm260_vm6  ;;  %v692_v61 = vmul.f32 0.03125, %v144_v14 }
 0x11d   :  { %v255_v23 = vmul.f32 %v524_v7, %v254_v12  ;;  %v172_v24 = vpop.xlane.xlu2 %171  ;;  %v238_v26 = vmul.f32 %v522_v62, %v237_v11 }
 0x11e   :  { %525 = vrsqrt.f32 %v661_v19  ;;  %v205_v28 = vsub.f32 %v189_v22, %v197_v18  ;;  %v188_v32 = vmul.f32 0.03125, %v172_v24  ;;  %v200_v12 = vmul.f32 %v692_v61, %v692_v61 }
 0x11f   :  { %v256_v29 = vmul.f32 0.5, %v255_v23  ;;  %v242_v33 = vsel %vm241_vm4, %v522_v62, %v238_v26  ;;  %vm299_vm13 = vweird.f32 %v661_v19 }
 0x120   :  { %v213_v35 = vmax.f32 %v205_v28, 0.0  ;;  %v313_v36 = vmul.f32 %v242_v33, %v217_v25  ;;  %v204_v38 = vsub.f32 %v188_v32, %v196_v30 }
 0x121   :  { %v257_v37 = vsub.f32 1.5, %v256_v29 }
 0x122   :  { %v671_v39 = vadd.f32 1e-05, %v213_v35  ;;  %347 = vperm.xlu1 %518, %v313_v36   ;;  %v212_v40 = vmax.f32 %v204_v38, 0.0  ;;  %v329_v50 = vmul.f32 %v313_v36, %v643_v43  ;;  %v221_v38 = vld [vmem:[%s825_s2 + $0x20] sm:$0xff] }
 0x123   :  { %v166_v41 = vpop.xlane.xlu0 %165  ;;  %v258_v44 = vmul.f32 %v524_v7, %v257_v37  ;;  %v178_v48 = vpop.xlane.xlu1 %177 }
 0x124   :  { %v676_v46 = vpop.eup %525  ;;  %527 = vrsqrt.f32 %v671_v39  ;;  %v186_v49 = vmul.f32 0.03125, %v166_v41  ;;  %v683_v51 = vadd.f32 1e-05, %v212_v40  ;;  %v190_v43 = vmul.f32 0.03125, %v178_v48 }
 0x125   :  { %v138_v52 = vpop.xlane.xlu2 %137  ;;  %v262_v53 = vsel %vm261_vm7, %v524_v7, %v258_v44  ;;  %v294_v55 = vmul.f32 %v676_v46, %v661_v19  ;;  %v337_v0 = vsub.f32 %v321_v54, %v329_v50  ;;  %vm279_vm9 = vweird.f32 %v671_v39 }
 0x126   :  { %v202_v56 = vsub.f32 %v186_v49, %v194_v47  ;;  %v690_v57 = vmul.f32 0.03125, %v138_v52  ;;  %v315_v60 = vmul.f32 %v262_v53, %v219_v42  ;;  %529 = vrsqrt.f32 %v683_v51  ;;  %v325_v53 = vld [vmem:[%s826_s3 + $0x20] sm:$0xff] }
 0x127   :  { %v295_v3 = vmul.f32 %v676_v46, %v294_v55  ;;  %vm300_vm11 = vweird.f32 %v676_v46  ;;  %vm269_vm14 = vweird.f32 %v683_v51 }
 0x128   :  { %v210_v62 = vmax.f32 %v202_v56, 0.0  ;;  %v198_v63 = vmul.f32 %v690_v57, %v690_v57  ;;  %357 = vperm.xlu0 %519, %v315_v60   ;;  %v331_v1 = vmul.f32 %v315_v60, %v645_v45  ;;  %vm729_vm15 = vmor %vm299_vm13, %vm300_vm11 }
 0x129   :  { %v296_v22 = vmul.f32 0.5, %v295_v3 }
 0x12a   :  { %v528_v2 = vpop.eup %527  ;;  %v702_v5 = vadd.f32 1e-05, %v210_v62  ;;  %v206_v6 = vsub.f32 %v190_v43, %v198_v63  ;;  %395 = vperm.xlu1 %518, %v337_v0   ;;  %v339_v7 = vsub.f32 %v323_v58, %v331_v1  ;;  %v223_v62 = vld [vmem:[%s825_s2 + $0x30] sm:$0xff]  ;;  %v218_v63 = vld [vmem:[%s825_s2 + $0x8] sm:$0xff]  ;;  %v220_v1 = vld [vmem:[%s825_s2 + $0x18] sm:$0xff] }
 0x12b   :  { %v274_v10 = vmul.f32 %v528_v2, %v671_v39  ;;  %v184_v11 = vpop.xlane.xlu0 %183  ;;  %vm280_vm8 = vweird.f32 %v528_v2  ;;  %v297_v33 = vsub.f32 1.5, %v296_v22 }
 0x12c   :  { %531 = vrsqrt.f32 %v702_v5  ;;  %v214_v14 = vmax.f32 %v206_v6, 0.0  ;;  %v192_v17 = vmul.f32 0.03125, %v184_v11  ;;  %405 = vperm.xlu2 %520, %v339_v7   ;;  %v530_v45 = vpop.eup %529  ;;  %vm281_vm10 = vmor %vm279_vm9, %vm280_vm8  ;;  %vm249_vm3 = vweird.f32 %v702_v5 }
 0x12d   :  { %v275_v18 = vmul.f32 %v528_v2, %v274_v10  ;;  %v264_v23 = vmul.f32 %v530_v45, %v683_v51  ;;  %v298_v49 = vmul.f32 %v676_v46, %v297_v33  ;;  %vm270_vm12 = vweird.f32 %v530_v45 }
 0x12e   :  { %v709_v24 = vadd.f32 1e-05, %v214_v14  ;;  %v208_v25 = vsub.f32 %v192_v17, %v200_v12  ;;  %vm733_vm2 = vmor %vm269_vm14, %vm270_vm12  ;;  %v322_v12 = vld [vmem:[%s826_s3 + $0x8] sm:$0xff] }
 0x12f   :  { %v276_v26 = vmul.f32 0.5, %v275_v18  ;;  %v265_v28 = vmul.f32 %v530_v45, %v264_v23 }
 0x130   :  { %533 = vrsqrt.f32 %v709_v24  ;;  %v216_v29 = vmax.f32 %v208_v25, 0.0  ;;  %v324_v25 = vld [vmem:[%s826_s3 + $0x18] sm:$0xff]  ;;  %vm289_vm9 = vweird.f32 %v709_v24 }
 0x131   :  { %v277_v30 = vsub.f32 1.5, %v276_v26  ;;  %v266_v35 = vmul.f32 0.5, %v265_v28  ;;  %v224_v26 = vld [vmem:[%s825_s2 + $0x38] sm:$0xff] }
 0x132   :  { %v532_v32 = vpop.eup %531  ;;  %v232_v36 = vadd.f32 1e-05, %v216_v29 }
 0x133   :  { %v244_v37 = vmul.f32 %v532_v32, %v702_v5  ;;  %v278_v40 = vmul.f32 %v528_v2, %v277_v30  ;;  %v267_v41 = vsub.f32 1.5, %v266_v35  ;;  %vm250_vm0 = vweird.f32 %v532_v32 }
 0x134   :  { %535 = vrsqrt.f32 %v232_v36  ;;  %vm251_vm4 = vmor %vm249_vm3, %vm250_vm0  ;;  %vm309_vm6 = vweird.f32 %v232_v36 }
 0x135   :  { %v245_v42 = vmul.f32 %v532_v32, %v244_v37  ;;  %v282_v44 = vsel %vm281_vm10, %v528_v2, %v278_v40  ;;  %v268_v39 = vmul.f32 %v530_v45, %v267_v41 }
 0x136   :  { %v717_v47 = vpop.eup %533  ;;  %v317_v48 = vmul.f32 %v282_v44, %v221_v38  ;;  %v327_v38 = vld [vmem:[%s826_s3 + $0x30] sm:$0xff] }
 0x137   :  { %v246_v50 = vmul.f32 0.5, %v245_v42  ;;  %v284_v52 = vmul.f32 %v717_v47, %v709_v24  ;;  %v272_v2 = vsel %vm733_vm2, %v530_v45, %v268_v39  ;;  %vm290_vm8 = vweird.f32 %v717_v47 }
 0x138   :  { %367 = vperm.xlu1 %518, %v317_v48   ;;  %v333_v54 = vmul.f32 %v317_v48, %v655_v4  ;;  %v302_v4 = vsel %vm729_vm15, %v676_v46, %v298_v49  ;;  %v316_v7 = vmul.f32 %v272_v2, %v220_v1  ;;  %vm291_vm10 = vmor %vm289_vm9, %vm290_vm8 }
 0x139   :  { %v247_v55 = vsub.f32 1.5, %v246_v50  ;;  %v285_v19 = vmul.f32 %v717_v47, %v284_v52  ;;  %v319_v5 = vmul.f32 %v302_v4, %v223_v62 }
 0x13a   :  { %v536_v60 = vpop.eup %535  ;;  %v341_v58 = vsub.f32 %v325_v53, %v333_v54  ;;  %v332_v18 = vmul.f32 %v316_v7, %v657_v13  ;;  %v328_v13 = vld [vmem:[%s826_s3 + $0x38] sm:$0xff] }
 0x13b   :  { %v304_v51 = vmul.f32 %v536_v60, %v232_v36  ;;  %v248_v0 = vmul.f32 %v532_v32, %v247_v55  ;;  %v286_v10 = vmul.f32 0.5, %v285_v19  ;;  %vm310_vm5 = vweird.f32 %v536_v60  ;;  %v222_v36 = vld [vmem:[%s825_s2 + $0x28] sm:$0xff] }
 0x13c   :  { %415 = vperm.xlu0 %519, %v341_v58   ;;  %vm311_vm7 = vmor %vm309_vm6, %vm310_vm5  ;;  %v335_v35 = vmul.f32 %v319_v5, %v651_v59  ;;  %v326_v59 = vld [vmem:[%s826_s3 + $0x28] sm:$0xff] }
 0x13d   :  { %v305_v46 = vmul.f32 %v536_v60, %v304_v51  ;;  %v252_v3 = vsel %vm251_vm4, %v532_v32, %v248_v0  ;;  %v287_v22 = vsub.f32 1.5, %v286_v10 }
 0x13e   :  { %v314_v6 = vmul.f32 %v252_v3, %v218_v63  ;;  %v343_v41 = vsub.f32 %v327_v38, %v335_v35 }
 0x13f   :  { %v306_v11 = vmul.f32 0.5, %v305_v46  ;;  %v288_v30 = vmul.f32 %v717_v47, %v287_v22 }
 0x140   :  { %377 = vperm.xlu1 %518, %v319_v5   ;;  %352 = vperm.xlu2 %520, %v314_v6   ;;  %v330_v14 = vmul.f32 %v314_v6, %v669_v34  ;;  %v340_v34 = vsub.f32 %v324_v25, %v332_v18 }
 0x141   :  { %v307_v17 = vsub.f32 1.5, %v306_v11  ;;  %v292_v37 = vsel %vm291_vm10, %v717_v47, %v288_v30 }
 0x142   :  { %v338_v45 = vsub.f32 %v322_v12, %v330_v14  ;;  %v318_v40 = vmul.f32 %v292_v37, %v222_v36 }
 0x143   :  { %v308_v23 = vmul.f32 %v536_v60, %v307_v17 }
 0x144   :  { %400 = vperm.xlu0 %519, %v338_v45  }
 0x145   :  { %v312_v28 = vsel %vm311_vm7, %v536_v60, %v308_v23 }
 0x146   :  { %v320_v29 = vmul.f32 %v312_v28, %v224_v26 }
 0x148   :  { %410 = vperm.xlu1 %518, %v340_v34   ;;  %362 = vperm.xlu2 %520, %v316_v7   ;;  %v336_v32 = vmul.f32 %v320_v29, %v692_v61  ;;  %v334_v61 = vmul.f32 %v318_v40, %v690_v57 }
 0x14a   :  { %v344_v33 = vsub.f32 %v328_v13, %v336_v32  ;;  %v342_v24 = vsub.f32 %v326_v59, %v334_v61 }
 0x14c   :  { %430 = vperm.xlu0 %519, %v344_v33  }
 0x150   :  { %425 = vperm.xlu1 %518, %v343_v41   ;;  %372 = vperm.xlu2 %520, %v318_v40  }
 0x158   :  { %382 = vperm.xlu2 %520, %v320_v29  }
 0x160   :  { %420 = vperm.xlu2 %520, %v342_v24  }
 0x186   :  { %v406_v42 = vpop.permute.xlu2 %405 }
 0x194   :  { %v348_v44 = vpop.permute.xlu1 %347 }
 0x195   :  { %v385_v49 = vmul.f32 %v348_v44, %v587_v8 }
 0x19a   :  { %v353_v47 = vpop.permute.xlu2 %352  ;;  %v358_v48 = vpop.permute.xlu0 %357 }
 0x19b   :  { %v387_v39 = vmul.f32 %v358_v48, %v589_v9  ;;  %v386_v51 = vmul.f32 %v353_v47, %v611_v21 }
 0x19c   :  { %v396_v50 = vpop.permute.xlu1 %395 }
 0x19d   :  { %v435_v52 = vadd.f32 %v406_v42, %v387_v39  ;;  %v433_v53 = vadd.f32 %v396_v50, %v385_v49 }
 0x19f   :  { %v443_v54 = vmax.f32 %v435_v52, 0.0  ;;  %v441_v55 = vmax.f32 %v433_v53, 0.0 }
 0x1a1   :  { %451 = vst.msk [vmem:[%s827_s4 + $0x10] sm:$0xff] %vm120_vm1, %v443_v54 }
 0x1a2   :  { %449 = vst.msk [vmem:[%s827_s4] sm:$0xff] %vm120_vm1, %v441_v55  ;;  %v363_v57 = vpop.permute.xlu2 %362 }
 0x1a3   :  { %v388_v0 = vmul.f32 %v363_v57, %v609_v20 }
 0x1aa   :  { %v368_v56 = vpop.permute.xlu1 %367  ;;  %v373_v8 = vpop.permute.xlu2 %372 }
 0x1ab   :  { %v389_v9 = vmul.f32 %v368_v56, %v602_v16  ;;  %v390_v1 = vmul.f32 %v373_v8, %v629_v31 }
 0x1ae   :  { %v416_v60 = vpop.permute.xlu0 %415 }
 0x1af   :  { %v437_v43 = vadd.f32 %v416_v60, %v389_v9 }
 0x1b1   :  { %v445_v58 = vmax.f32 %v437_v43, 0.0 }
 0x1b2   :  { %v378_v4 = vpop.permute.xlu1 %377  ;;  %v383_v19 = vpop.permute.xlu2 %382 }
 0x1b3   :  { %453 = vst.msk [vmem:[%s827_s4 + $0x20] sm:$0xff] %vm120_vm1, %v445_v58  ;;  %v392_v6 = vmul.f32 %v383_v19, %v622_v27  ;;  %v391_v31 = vmul.f32 %v378_v4, %v600_v15 }
 0x1b6   :  { %v401_v62 = vpop.permute.xlu0 %400 }
 0x1b7   :  { %v434_v63 = vadd.f32 %v401_v62, %v386_v51 }
 0x1b9   :  { %v442_v2 = vmax.f32 %v434_v63, 0.0 }
 0x1ba   :  { %v411_v16 = vpop.permute.xlu1 %410  ;;  %v421_v46 = vpop.permute.xlu2 %420 }
 0x1bb   :  { %450 = vst.msk [vmem:[%s827_s4 + $0x8] sm:$0xff] %vm120_vm1, %v442_v2  ;;  %v436_v3 = vadd.f32 %v411_v16, %v388_v0  ;;  %v438_v5 = vadd.f32 %v421_v46, %v390_v1 }
 0x1bd   :  { %v444_v7 = vmax.f32 %v436_v3, 0.0  ;;  %v446_v21 = vmax.f32 %v438_v5, 0.0 }
 0x1be   :  { %v431_v10 = vpop.permute.xlu0 %430 }
 0x1bf   :  { %452 = vst.msk [vmem:[%s827_s4 + $0x18] sm:$0xff] %vm120_vm1, %v444_v7  ;;  %v440_v20 = vadd.f32 %v431_v10, %v392_v6 }
 0x1c0   :  { %454 = vst.msk [vmem:[%s827_s4 + $0x28] sm:$0xff] %vm120_vm1, %v446_v21 }
 0x1c1   :  { %v448_v11 = vmax.f32 %v440_v20, 0.0 }
 0x1c2   :  { %v426_v12 = vpop.permute.xlu1 %425 }
 0x1c3   :  { %456 = vst.msk [vmem:[%s827_s4 + $0x38] sm:$0xff] %vm120_vm1, %v448_v11  ;;  %v439_v27 = vadd.f32 %v426_v12, %v391_v31 }
 0x1c5   :  { %v447_v14 = vmax.f32 %v439_v27, 0.0 }
 0x1c7   :  { %455 = vst.msk [vmem:[%s827_s4 + $0x30] sm:$0xff] %vm120_vm1, %v447_v14 }

</bundles_post_ra>
